<compile_context>
chip_gen: v7x
topology: tpu7x:2x2x1
jax: 0.10.0
libtpu: 0.0.40
codegen_flags: <defaults>
</compile_context>

<pallas_src>
import functools
import math

import jax
import jax.numpy as jnp
from jax import lax
from jax.experimental import pallas as pl
from jax.experimental.pallas import tpu as pltpu


def encoder_layer_kernel(x_ref, bias_ref,
                         wqkv_ref, bqkv_ref, wo_ref, bo_ref,
                         ln1_g_ref, ln1_b_ref,
                         w1_ref, b1_ref, w2_ref, b2_ref,
                         ln2_g_ref, ln2_b_ref,
                         out_ref, ctx_scr,
                         *, S, H, n_heads, head_dim, eps=1e-5):
    """Grid = (batch, layer). One grid step == one encoder layer for one batch.

    The activation for this batch lives in out_ref (constant block index across
    the layer axis => stays VMEM-resident, written back to HBM once at the end).
    """
    layer = pl.program_id(1)

    # Load the embedded tokens into the carried activation on layer 0.
    @pl.when(layer == 0)
    def _():
        out_ref[...] = x_ref[...]

    x2d = out_ref[...]                                   # (S, H) f32

    # ---- fused QKV projection: one wide MXU matmul (bf16 in, f32 acc) ------
    # 1/sqrt(head_dim) is already folded into the Q columns of wqkv/bqkv.
    qkv = jnp.dot(x2d.astype(jnp.bfloat16), wqkv_ref[...],
                  preferred_element_type=jnp.float32) + bqkv_ref[...]   # (S, 3H)
    q = qkv[:, :H].astype(jnp.bfloat16)                  # cast once, not per head
    k = qkv[:, H:2 * H].astype(jnp.bfloat16)
    v = qkv[:, 2 * H:].astype(jnp.bfloat16)

    # Additive key-padding bias, broadcast once (JAX does not CSE broadcasts).
    bias = jnp.broadcast_to(bias_ref[...], (S, S))       # (S, S) f32

    # ---- multi-head attention ----------------------------------------------
    # Each head's context goes into its lane offset of ctx_scr; the output
    # projection is then a single full-depth (S,H)@(H,H) matmul.
    # TODO(synk): for large n_heads / head_dim, move heads to a lax.fori_loop
    # (dynamic lane slices) to bound vreg live ranges; trip counts here are tiny.
    for h in range(n_heads):
        lo = h * head_dim
        qh = q[:, lo:lo + head_dim]                      # (S, hd) bf16
        kh = k[:, lo:lo + head_dim]
        vh = v[:, lo:lo + head_dim]
        # energy = (Q / sqrt(hd)) @ K^T + mask_bias
        e = lax.dot_general(qh, kh, (((1,), (1,)), ((), ())),
                            preferred_element_type=jnp.float32) + bias
        e = e - jnp.max(e, axis=-1, keepdims=True)
        p = jnp.exp(e)
        attn = p * pl.reciprocal(jnp.sum(p, axis=-1, keepdims=True), approx=True)
        hv = jnp.dot(attn.astype(jnp.bfloat16), vh,
                     preferred_element_type=jnp.float32)  # (S, hd)
        ctx_scr[:, lo:lo + head_dim] = hv                 # lane-offset write

    attn_proj = jnp.dot(ctx_scr[...].astype(jnp.bfloat16), wo_ref[...],
                        preferred_element_type=jnp.float32) + bo_ref[...]  # (S, H)

    # ---- residual + LayerNorm 1 (two-pass variance, eps=1e-5) --------------
    y = x2d + attn_proj
    mu = jnp.mean(y, axis=-1, keepdims=True)
    yc = y - mu
    var = jnp.mean(yc * yc, axis=-1, keepdims=True)
    y = yc * lax.rsqrt(var + eps) * ln1_g_ref[...] + ln1_b_ref[...]

    # ---- position-wise feed-forward: fc2(relu(fc1(y))) ----------------------
    h1 = jnp.maximum(
        jnp.dot(y.astype(jnp.bfloat16), w1_ref[...],
                preferred_element_type=jnp.float32) + b1_ref[...],
        0.0).astype(jnp.bfloat16)                        # shrink largest interm.
    ff = jnp.dot(h1, w2_ref[...],
                 preferred_element_type=jnp.float32) + b2_ref[...]

    # ---- residual + LayerNorm 2 ---------------------------------------------
    z = y + ff
    mu2 = jnp.mean(z, axis=-1, keepdims=True)
    zc = z - mu2
    var2 = jnp.mean(zc * zc, axis=-1, keepdims=True)
    out_ref[...] = zc * lax.rsqrt(var2 + eps) * ln2_g_ref[...] + ln2_b_ref[...]


def encoder_forward(src_tokens, src_mask, params, n_heads):
    B, S = src_tokens.shape
    H = params["embedding"].shape[1]
    L = params["wqkv"].shape[0]
    head_dim = H // n_heads

    # Embedding lookup (gather) — plain JAX glue; flatten batch into sublanes.
    x = params["embedding"][src_tokens].reshape(B * S, H).astype(jnp.float32)
    # positional_encoding(src) output is discarded in the reference -> no-op.
    # TODO(synk): dropout is identity (eval semantics); no stochastic path.

    # Additive key-padding bias: -1e10 where mask == 0.
    bias = jnp.where(src_mask == 0.0, jnp.float32(-1e10), jnp.float32(0.0))  # (B,1,S)

    weight_args = [params["wqkv"], params["bqkv"], params["wo"], params["bo"],
                   params["ln1_g"], params["ln1_b"],
                   params["w1"], params["b1"], params["w2"], params["b2"],
                   params["ln2_g"], params["ln2_b"]]

    def layer_spec(a):
        # Stream one layer of this stacked weight per layer-grid step; the
        # leading layer dim is squeezed so the kernel sees a 2-D ref.
        return pl.BlockSpec((pl.Squeezed(),) + a.shape[1:],
                            lambda b, l: (l,) + (0,) * (a.ndim - 1))

    in_specs = ([pl.BlockSpec((S, H), lambda b, l: (b, 0)),                 # x rows of this batch
                 pl.BlockSpec((pl.Squeezed(), 1, S), lambda b, l: (b, 0, 0))]  # (1,S) bias
                + [layer_spec(a) for a in weight_args])

    out2d = pl.pallas_call(
        functools.partial(encoder_layer_kernel, S=S, H=H,
                          n_heads=n_heads, head_dim=head_dim),
        out_shape=jax.ShapeDtypeStruct((B * S, H), jnp.float32),
        grid=(B, L),
        in_specs=in_specs,
        # Constant block index across the layer axis -> activation stays
        # VMEM-resident per batch and is written to HBM once at the end.
        out_specs=pl.BlockSpec((S, H), lambda b, l: (b, 0)),
        scratch_shapes=[pltpu.VMEM((S, H), jnp.float32)],   # per-head context buffer
        compiler_params=pltpu.CompilerParams(
            # batch rows parallel (v7x megacore), layers sequential.
            dimension_semantics=("parallel", "arbitrary"),
            # TODO(synk): for production H/P raise this (128 MiB on v5e/v6e)
            # and K-tile w1/w2 with an inner pipeline; toy shapes fit easily.
            vmem_limit_bytes=32 * 1024 * 1024),
    )(x, bias, *weight_args)
    return out2d.reshape(B, S, H)


def init_params(key, input_dim, hid_dim, n_layers, n_heads, pf_dim):
    H, P, L = hid_dim, pf_dim, n_layers
    head_dim = H // n_heads
    inv_scale = 1.0 / math.sqrt(head_dim)
    ks = jax.random.split(key, 9)

    def rnd(k, shape):
        return jax.random.normal(k, shape, jnp.float32) * 0.05

    # Fused QKV weight (H, 3H); fold 1/sqrt(head_dim) into the Q columns once.
    qscale = jnp.concatenate([jnp.full((H,), inv_scale, jnp.float32),
                              jnp.ones((2 * H,), jnp.float32)])
    wqkv = (rnd(ks[1], (L, H, 3 * H)) * qscale).astype(jnp.bfloat16)
    bqkv = rnd(ks[2], (L, 1, 3 * H)) * qscale

    return dict(
        embedding=rnd(ks[0], (input_dim, H)),
        wqkv=wqkv,                                   # matmul weights stored bf16
        bqkv=bqkv,
        wo=rnd(ks[3], (L, H, H)).astype(jnp.bfloat16),
        bo=rnd(ks[4], (L, 1, H)),
        ln1_g=jnp.ones((L, 1, H), jnp.float32),
        ln1_b=jnp.zeros((L, 1, H), jnp.float32),
        w1=rnd(ks[5], (L, H, P)).astype(jnp.bfloat16),
        b1=rnd(ks[6], (L, 1, P)),
        w2=rnd(ks[7], (L, P, H)).astype(jnp.bfloat16),
        b2=rnd(ks[8], (L, 1, H)),
        ln2_g=jnp.ones((L, 1, H), jnp.float32),
        ln2_b=jnp.zeros((L, 1, H), jnp.float32),
    )


if __name__ == "__main__":
    # Small shapes consistent with the module's forward.
    B, S = 2, 8
    input_dim, hid_dim, n_layers, n_heads, pf_dim = 50, 32, 2, 4, 64

    key = jax.random.PRNGKey(0)
    pkey, tkey = jax.random.split(key)

    params = init_params(pkey, input_dim, hid_dim, n_layers, n_heads, pf_dim)

    src = jax.random.randint(tkey, (B, S), 0, input_dim, dtype=jnp.int32)
    # src_mask: 1 = attend, 0 = padding (mask last two positions of batch 1).
    src_mask = jnp.ones((B, S), jnp.float32).at[1, -2:].set(0.0).reshape(B, 1, S)

    out = encoder_forward(src, src_mask, params, n_heads)
    jax.block_until_ready(out)
    assert out.shape == (B, S, hid_dim) and out.dtype == jnp.float32
    print("KERNEL_OK")
</pallas_src>

<mosaic_0001>
module attributes {stable_mosaic.version = 11 : i64} {
  func.func @encoder_layer_kernel(%arg0: i32, %arg1: i32, %arg2: memref<8x32xf32, #tpu.memory_space<vmem>>, %arg3: memref<1x1x8xf32, #tpu.memory_space<vmem>>, %arg4: memref<1x32x96xbf16, #tpu.memory_space<vmem>>, %arg5: memref<1x1x96xf32, #tpu.memory_space<vmem>>, %arg6: memref<1x32x32xbf16, #tpu.memory_space<vmem>>, %arg7: memref<1x1x32xf32, #tpu.memory_space<vmem>>, %arg8: memref<1x1x32xf32, #tpu.memory_space<vmem>>, %arg9: memref<1x1x32xf32, #tpu.memory_space<vmem>>, %arg10: memref<1x32x64xbf16, #tpu.memory_space<vmem>>, %arg11: memref<1x1x64xf32, #tpu.memory_space<vmem>>, %arg12: memref<1x64x32xbf16, #tpu.memory_space<vmem>>, %arg13: memref<1x1x32xf32, #tpu.memory_space<vmem>>, %arg14: memref<1x1x32xf32, #tpu.memory_space<vmem>>, %arg15: memref<1x1x32xf32, #tpu.memory_space<vmem>>, %arg16: memref<8x32xf32, #tpu.memory_space<vmem>>, %arg17: memref<8x32xf32, #tpu.memory_space<vmem>>) attributes {dimension_semantics = [#tpu.dimension_semantics<parallel>, #tpu.dimension_semantics<arbitrary>], iteration_bounds = array<i64: 2, 2>, scalar_prefetch = 0 : i64, scratch_operands = 1 : i64, tpu.core_type = #tpu.core_type<tc>, window_params = [{transform_indices = @transform_0, window_bounds = array<i64: 8, 32>}, {transform_indices = @transform_1, window_bounds = array<i64: 1, 1, 8>}, {transform_indices = @transform_2, window_bounds = array<i64: 1, 32, 96>}, {transform_indices = @transform_3, window_bounds = array<i64: 1, 1, 96>}, {transform_indices = @transform_4, window_bounds = array<i64: 1, 32, 32>}, {transform_indices = @transform_5, window_bounds = array<i64: 1, 1, 32>}, {transform_indices = @transform_6, window_bounds = array<i64: 1, 1, 32>}, {transform_indices = @transform_7, window_bounds = array<i64: 1, 1, 32>}, {transform_indices = @transform_8, window_bounds = array<i64: 1, 32, 64>}, {transform_indices = @transform_9, window_bounds = array<i64: 1, 1, 64>}, {transform_indices = @transform_10, window_bounds = array<i64: 1, 64, 32>}, {transform_indices = @transform_11, window_bounds = array<i64: 1, 1, 32>}, {transform_indices = @transform_12, window_bounds = array<i64: 1, 1, 32>}, {transform_indices = @transform_13, window_bounds = array<i64: 1, 1, 32>}, {transform_indices = @transform_14, window_bounds = array<i64: 8, 32>}]} {
    %c0_i32 = arith.constant 0 : i32
    %0 = arith.cmpi eq, %arg1, %c0_i32 : i32
    %1 = arith.extui %0 : i1 to i32
    %c0_i32_0 = arith.constant 0 : i32
    %2 = arith.cmpi ne, %1, %c0_i32_0 : i32
    scf.if %2 {
      %c0_80 = arith.constant 0 : index
      %c0_81 = arith.constant 0 : index
      %172 = vector.load %arg2[%c0_80, %c0_81] : memref<8x32xf32, #tpu.memory_space<vmem>>, vector<8x32xf32>
      %c0_82 = arith.constant 0 : index
      %c0_83 = arith.constant 0 : index
      %173 = vector.load %arg16[%c0_82, %c0_83] : memref<8x32xf32, #tpu.memory_space<vmem>>, vector<8x32xf32>
      tpu.vector_store %arg16[%c0_82, %c0_83], %172 {strides = array<i32>} : memref<8x32xf32, #tpu.memory_space<vmem>>, vector<8x32xf32>,
    } else {
    }
    %c0 = arith.constant 0 : index
    %c0_1 = arith.constant 0 : index
    %3 = vector.load %arg16[%c0, %c0_1] : memref<8x32xf32, #tpu.memory_space<vmem>>, vector<8x32xf32>
    %4 = arith.truncf %3 : vector<8x32xf32> to vector<8x32xbf16>
    %c0_2 = arith.constant 0 : index
    %c0_3 = arith.constant 0 : index
    %c0_4 = arith.constant 0 : index
    %5 = vector.load %arg4[%c0_2, %c0_3, %c0_4] : memref<1x32x96xbf16, #tpu.memory_space<vmem>>, vector<1x32x96xbf16>
    %6 = vector.shape_cast %5 : vector<1x32x96xbf16> to vector<32x96xbf16>
    %cst = arith.constant dense<0.000000e+00> : vector<8x96xf32>
    %7 = tpu.matmul %4, %6, %cst {dimension_numbers = #tpu.dot_dimension_numbers<[1], [0], [0], [1], [0, 0, 1, 1], [], []>} : vector<8x32xbf16>, vector<32x96xbf16>, vector<8x96xf32> -> vector<8x96xf32>
    %c0_5 = arith.constant 0 : index
    %c0_6 = arith.constant 0 : index
    %c0_7 = arith.constant 0 : index
    %8 = vector.load %arg5[%c0_5, %c0_6, %c0_7] : memref<1x1x96xf32, #tpu.memory_space<vmem>>, vector<1x1x96xf32>
    %9 = vector.shape_cast %8 : vector<1x1x96xf32> to vector<1x96xf32>
    %10 = vector.broadcast %9 : vector<1x96xf32> to vector<8x96xf32>
    %11 = arith.addf %7, %10 : vector<8x96xf32>
    %12 = vector.extract_strided_slice %11 {offsets = [0, 0], sizes = [8, 32], strides = [1, 1]} : vector<8x96xf32> to vector<8x32xf32>
    %13 = arith.truncf %12 : vector<8x32xf32> to vector<8x32xbf16>
    %14 = vector.extract_strided_slice %11 {offsets = [0, 32], sizes = [8, 32], strides = [1, 1]} : vector<8x96xf32> to vector<8x32xf32>
    %15 = arith.truncf %14 : vector<8x32xf32> to vector<8x32xbf16>
    %16 = vector.extract_strided_slice %11 {offsets = [0, 64], sizes = [8, 32], strides = [1, 1]} : vector<8x96xf32> to vector<8x32xf32>
    %17 = arith.truncf %16 : vector<8x32xf32> to vector<8x32xbf16>
    %c0_8 = arith.constant 0 : index
    %c0_9 = arith.constant 0 : index
    %c0_10 = arith.constant 0 : index
    %18 = vector.load %arg3[%c0_8, %c0_9, %c0_10] : memref<1x1x8xf32, #tpu.memory_space<vmem>>, vector<1x1x8xf32>
    %19 = vector.shape_cast %18 : vector<1x1x8xf32> to vector<1x8xf32>
    %20 = vector.shape_cast %19 : vector<1x8xf32> to vector<1x8xf32>
    %21 = vector.broadcast %20 : vector<1x8xf32> to vector<8x8xf32>
    %22 = vector.extract_strided_slice %13 {offsets = [0, 0], sizes = [8, 8], strides = [1, 1]} : vector<8x32xbf16> to vector<8x8xbf16>
    %23 = vector.extract_strided_slice %15 {offsets = [0, 0], sizes = [8, 8], strides = [1, 1]} : vector<8x32xbf16> to vector<8x8xbf16>
    %24 = vector.extract_strided_slice %17 {offsets = [0, 0], sizes = [8, 8], strides = [1, 1]} : vector<8x32xbf16> to vector<8x8xbf16>
    %cst_11 = arith.constant dense<0.000000e+00> : vector<8x8xf32>
    %25 = tpu.matmul %22, %23, %cst_11 {dimension_numbers = #tpu.dot_dimension_numbers<[1], [1], [0], [0], [0, 0, 1, 0], [], []>} : vector<8x8xbf16>, vector<8x8xbf16>, vector<8x8xf32> -> vector<8x8xf32>
    %26 = arith.addf %25, %21 : vector<8x8xf32>
    %cst_12 = arith.constant dense<0xFF800000> : vector<8xf32>
    %27 = vector.multi_reduction <maximumf>, %26, %cst_12 [1] : vector<8x8xf32> to vector<8xf32>
    %28 = vector.shape_cast %27 : vector<8xf32> to vector<8x1xf32>
    %29 = vector.broadcast %28 : vector<8x1xf32> to vector<8x8xf32>
    %30 = arith.subf %26, %29 : vector<8x8xf32>
    %31 = math.exp %30 : vector<8x8xf32>
    %cst_13 = arith.constant dense<0.000000e+00> : vector<8xf32>
    %32 = vector.multi_reduction <add>, %31, %cst_13 [1] : vector<8x8xf32> to vector<8xf32>
    %33 = vector.shape_cast %32 : vector<8xf32> to vector<8x1xf32>
    %34 = tpu.reciprocal %33 {approx = true} : vector<8x1xf32> -> vector<8x1xf32>
    %35 = vector.broadcast %34 : vector<8x1xf32> to vector<8x8xf32>
    %36 = arith.mulf %31, %35 : vector<8x8xf32>
    %37 = arith.truncf %36 : vector<8x8xf32> to vector<8x8xbf16>
    %cst_14 = arith.constant dense<0.000000e+00> : vector<8x8xf32>
    %38 = tpu.matmul %37, %24, %cst_14 {dimension_numbers = #tpu.dot_dimension_numbers<[1], [0], [0], [1], [0, 0, 1, 1], [], []>} : vector<8x8xbf16>, vector<8x8xbf16>, vector<8x8xf32> -> vector<8x8xf32>
    %c0_15 = arith.constant 0 : index
    %c0_16 = arith.constant 0 : index
    %39 = vector.load %arg17[%c0_15, %c0_16] : memref<8x32xf32, #tpu.memory_space<vmem>>, vector<8x8xf32>
    tpu.vector_store %arg17[%c0_15, %c0_16], %38 {strides = array<i32>} : memref<8x32xf32, #tpu.memory_space<vmem>>, vector<8x8xf32>,
    %40 = vector.extract_strided_slice %13 {offsets = [0, 8], sizes = [8, 8], strides = [1, 1]} : vector<8x32xbf16> to vector<8x8xbf16>
    %41 = vector.extract_strided_slice %15 {offsets = [0, 8], sizes = [8, 8], strides = [1, 1]} : vector<8x32xbf16> to vector<8x8xbf16>
    %42 = vector.extract_strided_slice %17 {offsets = [0, 8], sizes = [8, 8], strides = [1, 1]} : vector<8x32xbf16> to vector<8x8xbf16>
    %cst_17 = arith.constant dense<0.000000e+00> : vector<8x8xf32>
    %43 = tpu.matmul %40, %41, %cst_17 {dimension_numbers = #tpu.dot_dimension_numbers<[1], [1], [0], [0], [0, 0, 1, 0], [], []>} : vector<8x8xbf16>, vector<8x8xbf16>, vector<8x8xf32> -> vector<8x8xf32>
    %44 = arith.addf %43, %21 : vector<8x8xf32>
    %cst_18 = arith.constant dense<0xFF800000> : vector<8xf32>
    %45 = vector.multi_reduction <maximumf>, %44, %cst_18 [1] : vector<8x8xf32> to vector<8xf32>
    %46 = vector.shape_cast %45 : vector<8xf32> to vector<8x1xf32>
    %47 = vector.broadcast %46 : vector<8x1xf32> to vector<8x8xf32>
    %48 = arith.subf %44, %47 : vector<8x8xf32>
    %49 = math.exp %48 : vector<8x8xf32>
    %cst_19 = arith.constant dense<0.000000e+00> : vector<8xf32>
    %50 = vector.multi_reduction <add>, %49, %cst_19 [1] : vector<8x8xf32> to vector<8xf32>
    %51 = vector.shape_cast %50 : vector<8xf32> to vector<8x1xf32>
    %52 = tpu.reciprocal %51 {approx = true} : vector<8x1xf32> -> vector<8x1xf32>
    %53 = vector.broadcast %52 : vector<8x1xf32> to vector<8x8xf32>
    %54 = arith.mulf %49, %53 : vector<8x8xf32>
    %55 = arith.truncf %54 : vector<8x8xf32> to vector<8x8xbf16>
    %cst_20 = arith.constant dense<0.000000e+00> : vector<8x8xf32>
    %56 = tpu.matmul %55, %42, %cst_20 {dimension_numbers = #tpu.dot_dimension_numbers<[1], [0], [0], [1], [0, 0, 1, 1], [], []>} : vector<8x8xbf16>, vector<8x8xbf16>, vector<8x8xf32> -> vector<8x8xf32>
    %c0_21 = arith.constant 0 : index
    %c8 = arith.constant 8 : index
    %57 = vector.load %arg17[%c0_21, %c8] : memref<8x32xf32, #tpu.memory_space<vmem>>, vector<8x8xf32>
    tpu.vector_store %arg17[%c0_21, %c8], %56 {strides = array<i32>} : memref<8x32xf32, #tpu.memory_space<vmem>>, vector<8x8xf32>,
    %58 = vector.extract_strided_slice %13 {offsets = [0, 16], sizes = [8, 8], strides = [1, 1]} : vector<8x32xbf16> to vector<8x8xbf16>
    %59 = vector.extract_strided_slice %15 {offsets = [0, 16], sizes = [8, 8], strides = [1, 1]} : vector<8x32xbf16> to vector<8x8xbf16>
    %60 = vector.extract_strided_slice %17 {offsets = [0, 16], sizes = [8, 8], strides = [1, 1]} : vector<8x32xbf16> to vector<8x8xbf16>
    %cst_22 = arith.constant dense<0.000000e+00> : vector<8x8xf32>
    %61 = tpu.matmul %58, %59, %cst_22 {dimension_numbers = #tpu.dot_dimension_numbers<[1], [1], [0], [0], [0, 0, 1, 0], [], []>} : vector<8x8xbf16>, vector<8x8xbf16>, vector<8x8xf32> -> vector<8x8xf32>
    %62 = arith.addf %61, %21 : vector<8x8xf32>
    %cst_23 = arith.constant dense<0xFF800000> : vector<8xf32>
    %63 = vector.multi_reduction <maximumf>, %62, %cst_23 [1] : vector<8x8xf32> to vector<8xf32>
    %64 = vector.shape_cast %63 : vector<8xf32> to vector<8x1xf32>
    %65 = vector.broadcast %64 : vector<8x1xf32> to vector<8x8xf32>
    %66 = arith.subf %62, %65 : vector<8x8xf32>
    %67 = math.exp %66 : vector<8x8xf32>
    %cst_24 = arith.constant dense<0.000000e+00> : vector<8xf32>
    %68 = vector.multi_reduction <add>, %67, %cst_24 [1] : vector<8x8xf32> to vector<8xf32>
    %69 = vector.shape_cast %68 : vector<8xf32> to vector<8x1xf32>
    %70 = tpu.reciprocal %69 {approx = true} : vector<8x1xf32> -> vector<8x1xf32>
    %71 = vector.broadcast %70 : vector<8x1xf32> to vector<8x8xf32>
    %72 = arith.mulf %67, %71 : vector<8x8xf32>
    %73 = arith.truncf %72 : vector<8x8xf32> to vector<8x8xbf16>
    %cst_25 = arith.constant dense<0.000000e+00> : vector<8x8xf32>
    %74 = tpu.matmul %73, %60, %cst_25 {dimension_numbers = #tpu.dot_dimension_numbers<[1], [0], [0], [1], [0, 0, 1, 1], [], []>} : vector<8x8xbf16>, vector<8x8xbf16>, vector<8x8xf32> -> vector<8x8xf32>
    %c0_26 = arith.constant 0 : index
    %c16 = arith.constant 16 : index
    %75 = vector.load %arg17[%c0_26, %c16] : memref<8x32xf32, #tpu.memory_space<vmem>>, vector<8x8xf32>
    tpu.vector_store %arg17[%c0_26, %c16], %74 {strides = array<i32>} : memref<8x32xf32, #tpu.memory_space<vmem>>, vector<8x8xf32>,
    %76 = vector.extract_strided_slice %13 {offsets = [0, 24], sizes = [8, 8], strides = [1, 1]} : vector<8x32xbf16> to vector<8x8xbf16>
    %77 = vector.extract_strided_slice %15 {offsets = [0, 24], sizes = [8, 8], strides = [1, 1]} : vector<8x32xbf16> to vector<8x8xbf16>
    %78 = vector.extract_strided_slice %17 {offsets = [0, 24], sizes = [8, 8], strides = [1, 1]} : vector<8x32xbf16> to vector<8x8xbf16>
    %cst_27 = arith.constant dense<0.000000e+00> : vector<8x8xf32>
    %79 = tpu.matmul %76, %77, %cst_27 {dimension_numbers = #tpu.dot_dimension_numbers<[1], [1], [0], [0], [0, 0, 1, 0], [], []>} : vector<8x8xbf16>, vector<8x8xbf16>, vector<8x8xf32> -> vector<8x8xf32>
    %80 = arith.addf %79, %21 : vector<8x8xf32>
    %cst_28 = arith.constant dense<0xFF800000> : vector<8xf32>
    %81 = vector.multi_reduction <maximumf>, %80, %cst_28 [1] : vector<8x8xf32> to vector<8xf32>
    %82 = vector.shape_cast %81 : vector<8xf32> to vector<8x1xf32>
    %83 = vector.broadcast %82 : vector<8x1xf32> to vector<8x8xf32>
    %84 = arith.subf %80, %83 : vector<8x8xf32>
    %85 = math.exp %84 : vector<8x8xf32>
    %cst_29 = arith.constant dense<0.000000e+00> : vector<8xf32>
    %86 = vector.multi_reduction <add>, %85, %cst_29 [1] : vector<8x8xf32> to vector<8xf32>
    %87 = vector.shape_cast %86 : vector<8xf32> to vector<8x1xf32>
    %88 = tpu.reciprocal %87 {approx = true} : vector<8x1xf32> -> vector<8x1xf32>
    %89 = vector.broadcast %88 : vector<8x1xf32> to vector<8x8xf32>
    %90 = arith.mulf %85, %89 : vector<8x8xf32>
    %91 = arith.truncf %90 : vector<8x8xf32> to vector<8x8xbf16>
    %cst_30 = arith.constant dense<0.000000e+00> : vector<8x8xf32>
    %92 = tpu.matmul %91, %78, %cst_30 {dimension_numbers = #tpu.dot_dimension_numbers<[1], [0], [0], [1], [0, 0, 1, 1], [], []>} : vector<8x8xbf16>, vector<8x8xbf16>, vector<8x8xf32> -> vector<8x8xf32>
    %c0_31 = arith.constant 0 : index
    %c24 = arith.constant 24 : index
    %93 = vector.load %arg17[%c0_31, %c24] : memref<8x32xf32, #tpu.memory_space<vmem>>, vector<8x8xf32>
    tpu.vector_store %arg17[%c0_31, %c24], %92 {strides = array<i32>} : memref<8x32xf32, #tpu.memory_space<vmem>>, vector<8x8xf32>,
    %c0_32 = arith.constant 0 : index
    %c0_33 = arith.constant 0 : index
    %94 = vector.load %arg17[%c0_32, %c0_33] : memref<8x32xf32, #tpu.memory_space<vmem>>, vector<8x32xf32>
    %95 = arith.truncf %94 : vector<8x32xf32> to vector<8x32xbf16>
    %c0_34 = arith.constant 0 : index
    %c0_35 = arith.constant 0 : index
    %c0_36 = arith.constant 0 : index
    %96 = vector.load %arg6[%c0_34, %c0_35, %c0_36] : memref<1x32x32xbf16, #tpu.memory_space<vmem>>, vector<1x32x32xbf16>
    %97 = vector.shape_cast %96 : vector<1x32x32xbf16> to vector<32x32xbf16>
    %cst_37 = arith.constant dense<0.000000e+00> : vector<8x32xf32>
    %98 = tpu.matmul %95, %97, %cst_37 {dimension_numbers = #tpu.dot_dimension_numbers<[1], [0], [0], [1], [0, 0, 1, 1], [], []>} : vector<8x32xbf16>, vector<32x32xbf16>, vector<8x32xf32> -> vector<8x32xf32>
    %c0_38 = arith.constant 0 : index
    %c0_39 = arith.constant 0 : index
    %c0_40 = arith.constant 0 : index
    %99 = vector.load %arg7[%c0_38, %c0_39, %c0_40] : memref<1x1x32xf32, #tpu.memory_space<vmem>>, vector<1x1x32xf32>
    %100 = vector.shape_cast %99 : vector<1x1x32xf32> to vector<1x32xf32>
    %101 = vector.broadcast %100 : vector<1x32xf32> to vector<8x32xf32>
    %102 = arith.addf %98, %101 : vector<8x32xf32>
    %103 = arith.addf %3, %102 : vector<8x32xf32>
    %cst_41 = arith.constant dense<0.000000e+00> : vector<8xf32>
    %104 = vector.multi_reduction <add>, %103, %cst_41 [1] : vector<8x32xf32> to vector<8xf32>
    %105 = vector.shape_cast %104 : vector<8xf32> to vector<8x1xf32>
    %cst_42 = arith.constant 3.200000e+01 : f32
    %106 = vector.broadcast %cst_42 : f32 to vector<8x1xf32>
    %107 = arith.divf %105, %106 : vector<8x1xf32>
    %108 = vector.broadcast %107 : vector<8x1xf32> to vector<8x32xf32>
    %109 = arith.subf %103, %108 : vector<8x32xf32>
    %110 = arith.mulf %109, %109 : vector<8x32xf32>
    %cst_43 = arith.constant dense<0.000000e+00> : vector<8xf32>
    %111 = vector.multi_reduction <add>, %110, %cst_43 [1] : vector<8x32xf32> to vector<8xf32>
    %112 = vector.shape_cast %111 : vector<8xf32> to vector<8x1xf32>
    %cst_44 = arith.constant 3.200000e+01 : f32
    %113 = vector.broadcast %cst_44 : f32 to vector<8x1xf32>
    %114 = arith.divf %112, %113 : vector<8x1xf32>
    %cst_45 = arith.constant 9.99999974E-6 : f32
    %115 = vector.broadcast %cst_45 : f32 to vector<8x1xf32>
    %116 = arith.addf %114, %115 : vector<8x1xf32>
    %117 = math.rsqrt %116 : vector<8x1xf32>
    %118 = vector.broadcast %117 : vector<8x1xf32> to vector<8x32xf32>
    %119 = arith.mulf %109, %118 : vector<8x32xf32>
    %c0_46 = arith.constant 0 : index
    %c0_47 = arith.constant 0 : index
    %c0_48 = arith.constant 0 : index
    %120 = vector.load %arg8[%c0_46, %c0_47, %c0_48] : memref<1x1x32xf32, #tpu.memory_space<vmem>>, vector<1x1x32xf32>
    %121 = vector.shape_cast %120 : vector<1x1x32xf32> to vector<1x32xf32>
    %122 = vector.broadcast %121 : vector<1x32xf32> to vector<8x32xf32>
    %123 = arith.mulf %119, %122 : vector<8x32xf32>
    %c0_49 = arith.constant 0 : index
    %c0_50 = arith.constant 0 : index
    %c0_51 = arith.constant 0 : index
    %124 = vector.load %arg9[%c0_49, %c0_50, %c0_51] : memref<1x1x32xf32, #tpu.memory_space<vmem>>, vector<1x1x32xf32>
    %125 = vector.shape_cast %124 : vector<1x1x32xf32> to vector<1x32xf32>
    %126 = vector.broadcast %125 : vector<1x32xf32> to vector<8x32xf32>
    %127 = arith.addf %123, %126 : vector<8x32xf32>
    %128 = arith.truncf %127 : vector<8x32xf32> to vector<8x32xbf16>
    %c0_52 = arith.constant 0 : index
    %c0_53 = arith.constant 0 : index
    %c0_54 = arith.constant 0 : index
    %129 = vector.load %arg10[%c0_52, %c0_53, %c0_54] : memref<1x32x64xbf16, #tpu.memory_space<vmem>>, vector<1x32x64xbf16>
    %130 = vector.shape_cast %129 : vector<1x32x64xbf16> to vector<32x64xbf16>
    %cst_55 = arith.constant dense<0.000000e+00> : vector<8x64xf32>
    %131 = tpu.matmul %128, %130, %cst_55 {dimension_numbers = #tpu.dot_dimension_numbers<[1], [0], [0], [1], [0, 0, 1, 1], [], []>} : vector<8x32xbf16>, vector<32x64xbf16>, vector<8x64xf32> -> vector<8x64xf32>
    %c0_56 = arith.constant 0 : index
    %c0_57 = arith.constant 0 : index
    %c0_58 = arith.constant 0 : index
    %132 = vector.load %arg11[%c0_56, %c0_57, %c0_58] : memref<1x1x64xf32, #tpu.memory_space<vmem>>, vector<1x1x64xf32>
    %133 = vector.shape_cast %132 : vector<1x1x64xf32> to vector<1x64xf32>
    %134 = vector.broadcast %133 : vector<1x64xf32> to vector<8x64xf32>
    %135 = arith.addf %131, %134 : vector<8x64xf32>
    %cst_59 = arith.constant 0.000000e+00 : f32
    %136 = vector.broadcast %cst_59 : f32 to vector<8x64xf32>
    %137 = arith.maximumf %135, %136 : vector<8x64xf32>
    %138 = arith.truncf %137 : vector<8x64xf32> to vector<8x64xbf16>
    %c0_60 = arith.constant 0 : index
    %c0_61 = arith.constant 0 : index
    %c0_62 = arith.constant 0 : index
    %139 = vector.load %arg12[%c0_60, %c0_61, %c0_62] : memref<1x64x32xbf16, #tpu.memory_space<vmem>>, vector<1x64x32xbf16>
    %140 = vector.shape_cast %139 : vector<1x64x32xbf16> to vector<64x32xbf16>
    %cst_63 = arith.constant dense<0.000000e+00> : vector<8x32xf32>
    %141 = tpu.matmul %138, %140, %cst_63 {dimension_numbers = #tpu.dot_dimension_numbers<[1], [0], [0], [1], [0, 0, 1, 1], [], []>} : vector<8x64xbf16>, vector<64x32xbf16>, vector<8x32xf32> -> vector<8x32xf32>
    %c0_64 = arith.constant 0 : index
    %c0_65 = arith.constant 0 : index
    %c0_66 = arith.constant 0 : index
    %142 = vector.load %arg13[%c0_64, %c0_65, %c0_66] : memref<1x1x32xf32, #tpu.memory_space<vmem>>, vector<1x1x32xf32>
    %143 = vector.shape_cast %142 : vector<1x1x32xf32> to vector<1x32xf32>
    %144 = vector.broadcast %143 : vector<1x32xf32> to vector<8x32xf32>
    %145 = arith.addf %141, %144 : vector<8x32xf32>
    %146 = arith.addf %127, %145 : vector<8x32xf32>
    %cst_67 = arith.constant dense<0.000000e+00> : vector<8xf32>
    %147 = vector.multi_reduction <add>, %146, %cst_67 [1] : vector<8x32xf32> to vector<8xf32>
    %148 = vector.shape_cast %147 : vector<8xf32> to vector<8x1xf32>
    %cst_68 = arith.constant 3.200000e+01 : f32
    %149 = vector.broadcast %cst_68 : f32 to vector<8x1xf32>
    %150 = arith.divf %148, %149 : vector<8x1xf32>
    %151 = vector.broadcast %150 : vector<8x1xf32> to vector<8x32xf32>
    %152 = arith.subf %146, %151 : vector<8x32xf32>
    %153 = arith.mulf %152, %152 : vector<8x32xf32>
    %cst_69 = arith.constant dense<0.000000e+00> : vector<8xf32>
    %154 = vector.multi_reduction <add>, %153, %cst_69 [1] : vector<8x32xf32> to vector<8xf32>
    %155 = vector.shape_cast %154 : vector<8xf32> to vector<8x1xf32>
    %cst_70 = arith.constant 3.200000e+01 : f32
    %156 = vector.broadcast %cst_70 : f32 to vector<8x1xf32>
    %157 = arith.divf %155, %156 : vector<8x1xf32>
    %cst_71 = arith.constant 9.99999974E-6 : f32
    %158 = vector.broadcast %cst_71 : f32 to vector<8x1xf32>
    %159 = arith.addf %157, %158 : vector<8x1xf32>
    %160 = math.rsqrt %159 : vector<8x1xf32>
    %161 = vector.broadcast %160 : vector<8x1xf32> to vector<8x32xf32>
    %162 = arith.mulf %152, %161 : vector<8x32xf32>
    %c0_72 = arith.constant 0 : index
    %c0_73 = arith.constant 0 : index
    %c0_74 = arith.constant 0 : index
    %163 = vector.load %arg14[%c0_72, %c0_73, %c0_74] : memref<1x1x32xf32, #tpu.memory_space<vmem>>, vector<1x1x32xf32>
    %164 = vector.shape_cast %163 : vector<1x1x32xf32> to vector<1x32xf32>
    %165 = vector.broadcast %164 : vector<1x32xf32> to vector<8x32xf32>
    %166 = arith.mulf %162, %165 : vector<8x32xf32>
    %c0_75 = arith.constant 0 : index
    %c0_76 = arith.constant 0 : index
    %c0_77 = arith.constant 0 : index
    %167 = vector.load %arg15[%c0_75, %c0_76, %c0_77] : memref<1x1x32xf32, #tpu.memory_space<vmem>>, vector<1x1x32xf32>
    %168 = vector.shape_cast %167 : vector<1x1x32xf32> to vector<1x32xf32>
    %169 = vector.broadcast %168 : vector<1x32xf32> to vector<8x32xf32>
    %170 = arith.addf %166, %169 : vector<8x32xf32>
    %c0_78 = arith.constant 0 : index
    %c0_79 = arith.constant 0 : index
    %171 = vector.load %arg16[%c0_78, %c0_79] : memref<8x32xf32, #tpu.memory_space<vmem>>, vector<8x32xf32>
    tpu.vector_store %arg16[%c0_78, %c0_79], %170 {strides = array<i32>} : memref<8x32xf32, #tpu.memory_space<vmem>>, vector<8x32xf32>,
    return
  }
  func.func @transform_0(%arg0: i32, %arg1: i32) -> (i32, i32) {
    %c0_i32 = arith.constant 0 : i32
    %c0_i32_0 = arith.constant 0 : i32
    return %arg0, %c0_i32 : i32, i32
  }
  func.func @transform_1(%arg0: i32, %arg1: i32) -> (i32, i32, i32) {
    %c0_i32 = arith.constant 0 : i32
    %c0_i32_0 = arith.constant 0 : i32
    %c0_i32_1 = arith.constant 0 : i32
    return %arg0, %c0_i32, %c0_i32_0 : i32, i32, i32
  }
  func.func @transform_2(%arg0: i32, %arg1: i32) -> (i32, i32, i32) {
    %c0_i32 = arith.constant 0 : i32
    %c0_i32_0 = arith.constant 0 : i32
    %c0_i32_1 = arith.constant 0 : i32
    return %arg1, %c0_i32, %c0_i32_0 : i32, i32, i32
  }
  func.func @transform_3(%arg0: i32, %arg1: i32) -> (i32, i32, i32) {
    %c0_i32 = arith.constant 0 : i32
    %c0_i32_0 = arith.constant 0 : i32
    %c0_i32_1 = arith.constant 0 : i32
    return %arg1, %c0_i32, %c0_i32_0 : i32, i32, i32
  }
  func.func @transform_4(%arg0: i32, %arg1: i32) -> (i32, i32, i32) {
    %c0_i32 = arith.constant 0 : i32
    %c0_i32_0 = arith.constant 0 : i32
    %c0_i32_1 = arith.constant 0 : i32
    return %arg1, %c0_i32, %c0_i32_0 : i32, i32, i32
  }
  func.func @transform_5(%arg0: i32, %arg1: i32) -> (i32, i32, i32) {
    %c0_i32 = arith.constant 0 : i32
    %c0_i32_0 = arith.constant 0 : i32
    %c0_i32_1 = arith.constant 0 : i32
    return %arg1, %c0_i32, %c0_i32_0 : i32, i32, i32
  }
  func.func @transform_6(%arg0: i32, %arg1: i32) -> (i32, i32, i32) {
    %c0_i32 = arith.constant 0 : i32
    %c0_i32_0 = arith.constant 0 : i32
    %c0_i32_1 = arith.constant 0 : i32
    return %arg1, %c0_i32, %c0_i32_0 : i32, i32, i32
  }
  func.func @transform_7(%arg0: i32, %arg1: i32) -> (i32, i32, i32) {
    %c0_i32 = arith.constant 0 : i32
    %c0_i32_0 = arith.constant 0 : i32
    %c0_i32_1 = arith.constant 0 : i32
    return %arg1, %c0_i32, %c0_i32_0 : i32, i32, i32
  }
  func.func @transform_8(%arg0: i32, %arg1: i32) -> (i32, i32, i32) {
    %c0_i32 = arith.constant 0 : i32
    %c0_i32_0 = arith.constant 0 : i32
    %c0_i32_1 = arith.constant 0 : i32
    return %arg1, %c0_i32, %c0_i32_0 : i32, i32, i32
  }
  func.func @transform_9(%arg0: i32, %arg1: i32) -> (i32, i32, i32) {
    %c0_i32 = arith.constant 0 : i32
    %c0_i32_0 = arith.constant 0 : i32
    %c0_i32_1 = arith.constant 0 : i32
    return %arg1, %c0_i32, %c0_i32_0 : i32, i32, i32
  }
  func.func @transform_10(%arg0: i32, %arg1: i32) -> (i32, i32, i32) {
    %c0_i32 = arith.constant 0 : i32
    %c0_i32_0 = arith.constant 0 : i32
    %c0_i32_1 = arith.constant 0 : i32
    return %arg1, %c0_i32, %c0_i32_0 : i32, i32, i32
  }
  func.func @transform_11(%arg0: i32, %arg1: i32) -> (i32, i32, i32) {
    %c0_i32 = arith.constant 0 : i32
    %c0_i32_0 = arith.constant 0 : i32
    %c0_i32_1 = arith.constant 0 : i32
    return %arg1, %c0_i32, %c0_i32_0 : i32, i32, i32
  }
  func.func @transform_12(%arg0: i32, %arg1: i32) -> (i32, i32, i32) {
    %c0_i32 = arith.constant 0 : i32
    %c0_i32_0 = arith.constant 0 : i32
    %c0_i32_1 = arith.constant 0 : i32
    return %arg1, %c0_i32, %c0_i32_0 : i32, i32, i32
  }
  func.func @transform_13(%arg0: i32, %arg1: i32) -> (i32, i32, i32) {
    %c0_i32 = arith.constant 0 : i32
    %c0_i32_0 = arith.constant 0 : i32
    %c0_i32_1 = arith.constant 0 : i32
    return %arg1, %c0_i32, %c0_i32_0 : i32, i32, i32
  }
  func.func @transform_14(%arg0: i32, %arg1: i32) -> (i32, i32) {
    %c0_i32 = arith.constant 0 : i32
    %c0_i32_0 = arith.constant 0 : i32
    return %arg0, %c0_i32 : i32, i32
  }
}

</mosaic_0001>

<bundles_post_ra>
// kernel: tpu_custom_call.1
= control target key start
LH: loop header
LB: loop body
LE: loop exit
PB: predicated region body
PF: predicated region fallthrough
CT: control target
= control target key end

     0   :  { %s3193_s0 = inlined_call_operand.hbm [shape: f32[16,32], index: 0, kind: input, shape index: {}]   ;;  %s3194_s1 = inlined_call_operand.vmem [shape: f32[2,1,8], index: 1, kind: input, shape index: {}]   ;;  %s3195_s2 = inlined_call_operand.vmem [shape: bf16[2,32,96], index: 2, kind: input, shape index: {}]   ;;  %s3196_s3 = inlined_call_operand.vmem [shape: f32[2,1,96], index: 3, kind: input, shape index: {}]   ;;  %s3197_s4 = inlined_call_operand.vmem [shape: bf16[2,32,32], index: 4, kind: input, shape index: {}]   ;;  %s3198_s5 = inlined_call_operand.hbm [shape: f32[2,1,32], index: 5, kind: input, shape index: {}]   ;;  %s3199_s6 = inlined_call_operand.hbm [shape: f32[2,1,32], index: 6, kind: input, shape index: {}]   ;;  %s3200_s7 = inlined_call_operand.hbm [shape: f32[2,1,32], index: 7, kind: input, shape index: {}]   ;;  %s3201_s8 = inlined_call_operand.vmem [shape: bf16[2,32,64], index: 8, kind: input, shape index: {}]   ;;  %s3202_s9 = inlined_call_operand.hbm [shape: f32[2,1,64], index: 9, kind: input, shape index: {}]   ;;  %s3203_s10 = inlined_call_operand.vmem [shape: bf16[2,64,32], index: 10, kind: input, shape index: {}]   ;;  %s3204_s11 = inlined_call_operand.vmem [shape: f32[2,1,32], index: 11, kind: input, shape index: {}]   ;;  %s3205_s12 = inlined_call_operand.vmem [shape: f32[2,1,32], index: 12, kind: input, shape index: {}]   ;;  %s3206_s13 = inlined_call_operand.vmem [shape: f32[2,1,32], index: 13, kind: input, shape index: {}]   ;;  %s3207_s14 = inlined_call_operand.hbm [shape: f32[16,32], index: 14, kind: output, shape index: {}]  }
   0x1   :  { %3233 = sst [smem:[#allocation32_spill]] %s3193_s0 }
   0x2   :  { %3234 = sst [smem:[#allocation33_spill]] %s3194_s1 }
   0x3   :  { %3235 = sst [smem:[#allocation34_spill]] %s3195_s2 }
   0x4   :  { %3236 = sst [smem:[#allocation35_spill]] %s3196_s3 }
   0x5   :  { %3237 = sst [smem:[#allocation36_spill]] %s3197_s4 }
   0x6   :  { %3238 = sst [smem:[#allocation37_spill]] %s3198_s5 }
   0x7   :  { %3239 = sst [smem:[#allocation38_spill]] %s3199_s6 }
   0x8   :  { %3240 = sst [smem:[#allocation39_spill]] %s3200_s7 }
   0x9   :  { %3241 = sst [smem:[#allocation40_spill]] %s3201_s8 }
   0xa   :  { %3242 = sst [smem:[#allocation41_spill]] %s3202_s9 }
   0xb   :  { %3243 = sst [smem:[#allocation42_spill]] %s3203_s10 }
   0xc   :  { %3244 = sst [smem:[#allocation43_spill]] %s3204_s11 }
   0xd   :  { %3245 = sst [smem:[#allocation44_spill]] %s3205_s12 }
   0xe   :  { %3246 = sst [smem:[#allocation45_spill]] %s3206_s13 }
   0xf   :  { %3247 = sst [smem:[#allocation46_spill]] %s3207_s14 }
  0x10   :  { %19 = vsyncpa [#allocation4], 0 }
  0x11   :  { %21 = vsyncpa [#allocation4 + $0x1], 0 }
  0x12   :  { %22 = vsyncpa [#allocation7], 0 }
  0x13   :  { %24 = vsyncpa [#allocation7 + $0x1], 0 }
  0x14   :  { %25 = vsyncpa [#allocation10], 0 }
  0x15   :  { %27 = vsyncpa [#allocation10 + $0x1], 0 }
  0x16   :  { %28 = vsyncpa [#allocation5], 0 }
  0x17   :  { %30 = vsyncpa [#allocation5 + $0x1], 0  ;;  %s2586_s29 = smov 0   ;;  %s2588_s30 = smov 0  }
  0x18   :  { %s2590_s15 = smov 0   ;;  %s2592_s16 = smov 0  }
  0x19   :  { %s2594_s17 = smov 0   ;;  %s2596_s18 = smov 0  }
  0x1a   :  { %s2598_s19 = smov 0   ;;  %s2600_s20 = smov 0  }
  0x1b   :  { %s2602_s21 = smov 0   ;;  %s2604_s22 = smov 0  }
  0x1c   :  { %s2606_s23 = smov 0  }
  0x1d LB: > { %3248 = sst [smem:[#allocation17_spill]] %s2451_s30  ;;  %s45_s24 = sadd.s32 1, %s2479_s21  ;;  %s2487_s23 = sphi %s2606_s23, %s36_s23   ;;  %s2483_s22 = sphi %s2604_s22, %s3329_s22   ;;  %s2479_s21 = sphi %s2602_s21, %s3328_s21   ;;  %s2475_s20 = sphi %s2600_s20, %s3327_s20   ;;  %s2471_s19 = sphi %s2598_s19, %s3326_s19   ;;  %s2467_s18 = sphi %s2596_s18, %s3325_s18   ;;  %s2463_s17 = sphi %s2594_s17, %s3324_s17   ;;  %s2459_s16 = sphi %s2592_s16, %s3323_s16   ;;  %s2455_s15 = sphi %s2590_s15, %s3322_s15   ;;  %s2451_s30 = sphi %s2588_s30, %s3321_s30   ;;  %s2447_s29 = sphi %s2586_s29, %s3320_s29  }
  0x1e   : > { %3249 = sst [smem:[#allocation18_spill]] %s2455_s15  ;;  %p3213_p0 = scmp.eq.s32.totalorder %s2487_s23, 0 }
  0x1f   : > { %3250 = sst [smem:[#allocation19_spill]] %s2459_s16  ;;  %p2643_p1 = scmp.ge.s32.totalorder %s45_s24, 2 }
  0x20   : > { %3251 = sst [smem:[#allocation20_spill]] %s2463_s17  ;;  %s185_s26 = sadd.s32 1, %s2455_s15 }
  0x21   : > { %3252 = sst [smem:[#allocation21_spill]] %s2467_s18  ;;  %p192_p2 = scmp.ne.s32.totalorder %s2455_s15, %s2451_s30 }
  0x22   : > { %3253 = sst [smem:[#allocation22_spill]] %s2471_s19  ;;  %s3331_s24 = smov (%p2643_p1, %s45_s24), 0 }
  0x23   : > { %3254 = sst [smem:[#allocation23_spill]] %s2475_s20  ;;  %p194_p4 = por %p192_p2, %p3213_p0 }
  0x24   : > { %3255 = sst [smem:[#allocation24_spill]] %s2479_s21  ;;  %s182_s27 = ssub.s32 %s2479_s21, %s3331_s24 }
  0x25   : > { %3256 = sst [smem:[#allocation25_spill]] %s2483_s22  ;;  %p3212_p5 = scmp.lt.s32.totalorder %s2487_s23, 4 }
  0x26   : > { %s3257_s25 = scalar_select %p2643_p1, 1, 0 }
  0x27   : > { %3258 = sst [smem:[#allocation26_spill]] %s3331_s24  ;;  %p183_p6 = scmp.eq.s32.totalorder %s182_s27, 0 }
  0x28   : > { %s3214_s28 = sand.u32 1, %s2487_s23   ;;  %s2663_s14 = sand.u32 1, %s2455_s15  }
  0x29   : > { %s2666_s13 = scalar_select %p183_p6, %s2455_s15, %s185_s26  }
  0x2a   : > { %s2669_s12 = sshll.u32 %s2479_s21, 4  ;;  %s3260_s5 = sld [smem:[#allocation37_spill]] }
  0x2b   : > { %3259 = sst [smem:[#allocation27_spill]] %s2666_s13  ;;  %s505_s24 = scalar_lea.vmem [#allocation6], %s2663_s14 }
  0x2c   : > { %s512_s27 = sshll.u32 %s505_s24, 4  ;;  %p2682_p7 = pnand %p3212_p5, %p194_p4  ;;  %s2678_s27 = int_to_ptr.vmem [resolvable:$true] %s512_s27 }
  0x2d   : > { %s2690_s10 = scalar_lea.sflag [#allocation7], %s3214_s28 }
  0x2e   : > { %s3261_s26 = scalar_select %p2682_p7, 1, 0 }
  0x2f   : > { %p2696_p11 = pneg %p2682_p7 }
  0x30   : > { %s2675_s8 = scalar_lea.hbm %s3260_s5, %s2669_s12  ;;  %s2212_s15 = scalar_lea.hbm %s3260_s5, 32 }
  0x31   : > { %s2207_s11 = scalar_lea.hbm %s2675_s8, 16  ;;  %p2213_p2 = scmp.lt.u32.totalorder %s2675_s8, %s3260_s5 }
  0x32   : > { %p2208_p10 = scmp.ne.s32.totalorder %s2675_s8, %s2207_s11  ;;  %p2214_p4 = scmp.lt.u32.totalorder %s2212_s15, %s2207_s11 }
  0x33   : > { %p2216_p5 = scmp.lt.u32.totalorder %s2207_s11, %s2675_s8 }
  0x34   : > { %p2210_p12 = pnand %p2696_p11, %p2208_p10  ;;  %p2215_p6 = por %p2214_p4, %p2213_p2 }
  0x36   : > { %p2211_p13 = pneg %p2210_p12  ;;  %p2217_p3 = por %p2216_p5, %p2215_p6 }
  0x38   : > { %p2218_p0 = pnand %p2217_p3, %p2211_p13 }
  0x3a   : > { %2221 = shalt.err (!%p2218_p0)
}
  0x3b   : > { %s2222_s28 = scalar_lea.vmem %s2678_s27, 16  ;;  %s2489_s13 = smov [#allocation6]  }
  0x3c   : > { %p2223_p10 = scmp.ne.s32.totalorder %s2678_s27, %s2222_s28  ;;  %s2227_s24 = sshll.u32 %s2489_s13, 4  ;;  %s2228_s24 = int_to_ptr.vmem [resolvable:$false] %s2227_s24 }
  0x3d   : > { %s2229_s2 = scalar_lea.vmem %s2228_s24, 32  ;;  %p2230_p9 = scmp.lt.s32.totalorder %s2678_s27, %s2228_s24 }
  0x3e   : > { %p2225_p12 = pnand %p2223_p10, %p2696_p11  ;;  %p2231_p1 = scmp.lt.s32.totalorder %s2229_s2, %s2222_s28 }
  0x40   : > { %p2226_p8 = pneg %p2225_p12  ;;  %p2232_p2 = por %p2231_p1, %p2230_p9 }
  0x42   : > { %p2233_p4 = pnand %p2232_p2, %p2226_p8 }
  0x44   : > { %2236 = shalt.err (!%p2233_p4)
}
  0x45   : > { %2057 = dma.hbm_to_vmem [thread:$0]  (!%p2682_p7), %s2675_s8, 16, %s2678_s27, %s2690_s10  }
  0x46   : > { %p3263_p0 = scmp.lt.s32.totalorder %s2487_s23, 5  ;;  %p3264_p3 = scmp.ge.s32.totalorder %s2487_s23, 1 }
  0x47   : > { %s3266_s7 = sld [smem:[#allocation39_spill]]  ;;  %s539_s13 = scalar_lea.vmem [#allocation9], %s2663_s14 }
  0x48   : > { %p2724_p5 = pnand %p3264_p3, %p3263_p0  ;;  %s546_s24 = sshll.u32 %s539_s13, 4  ;;  %s547_s24 = int_to_ptr.vmem [resolvable:$true] %s546_s24 }
  0x49   : > { %s3267_s2 = sand.u32 1, %s2487_s23  }
  0x4a   : > { %s3265_s4 = scalar_select %p2724_p5, 1, 0 }
  0x4b   : > { %s2737_s8 = scalar_lea.sflag [#allocation10], %s3267_s2 }
  0x4d   : > { %s2732_s11 = scalar_lea.hbm %s3266_s7, %s2669_s12  ;;  %s2242_s15 = scalar_lea.hbm %s3266_s7, 32 }
  0x4e   : > { %s2237_s27 = scalar_lea.hbm %s2732_s11, 16  ;;  %p2243_p13 = scmp.lt.u32.totalorder %s2732_s11, %s3266_s7 }
  0x4f   : > { %p2238_p1 = scmp.ne.s32.totalorder %s2732_s11, %s2237_s27  ;;  %p2244_p6 = scmp.lt.u32.totalorder %s2242_s15, %s2237_s27 }
  0x50   : > { %p2246_p12 = scmp.lt.u32.totalorder %s2237_s27, %s2732_s11 }
  0x51   : > { %p2240_p8 = pnand %p2238_p1, %p2696_p11  ;;  %p2245_p10 = por %p2244_p6, %p2243_p13 }
  0x53   : > { %p2241_p9 = pneg %p2240_p8  ;;  %p2247_p2 = por %p2246_p12, %p2245_p10 }
  0x55   : > { %p2248_p4 = pnand %p2247_p2, %p2241_p9 }
  0x57   : > { %2251 = shalt.err (!%p2248_p4)
}
  0x58   : > { %s2252_s13 = scalar_lea.vmem %s547_s24, 16  ;;  %s2490_s2 = smov [#allocation9]  }
  0x59   : > { %p2253_p0 = scmp.ne.s32.totalorder %s547_s24, %s2252_s13  ;;  %s2257_s19 = sshll.u32 %s2490_s2, 4  ;;  %s2258_s19 = int_to_ptr.vmem [resolvable:$false] %s2257_s19 }
  0x5a   : > { %s2259_s3 = scalar_lea.vmem %s2258_s19, 32  ;;  %p2260_p8 = scmp.lt.s32.totalorder %s547_s24, %s2258_s19 }
  0x5b   : > { %p2255_p3 = pnand %p2253_p0, %p2696_p11  ;;  %p2261_p5 = scmp.lt.s32.totalorder %s2259_s3, %s2252_s13 }
  0x5d   : > { %p2256_p1 = pneg %p2255_p3  ;;  %p2262_p7 = por %p2261_p5, %p2260_p8 }
  0x5f   : > { %p2263_p6 = pnand %p2262_p7, %p2256_p1 }
  0x61   : > { %2266 = shalt.err (!%p2263_p6)
}
  0x62   : > { %p3268_p13 = scmp.ne.s32.totalorder %s3261_s26, 0  ;;  %s2758_s1 = sadd.s32 4294967295, %s2487_s23  }
  0x63   : > { %s1865_s5 = sadd.s32 4294967294, %s2487_s23   ;;  %s48_s19 = sadd.s32 1, %s2483_s22 }
  0x64   : > { %2063 = dma.hbm_to_vmem [thread:$0]  (!%p3268_p13), %s2732_s11, 16, %s547_s24, %s2737_s8  }
  0x65   : > { %p3269_p7 = scmp.ne.s32.totalorder %s3257_s25, 0  ;;  %s55_s27 = sadd.s32 1, %s2467_s18 }
  0x66   : > { %p62_p5 = scmp.ne.s32.totalorder %s2467_s18, %s2463_s17  ;;  %p68_p10 = scmp.ne.s32.totalorder %s2463_s17, %s2459_s16 }
  0x67   : > { %s3333_s19 = smov (!%p3269_p7, %s48_s19), %s2483_s22  ;;  %p3270_p12 = scmp.eq.s32.totalorder %s2487_s23, 0 }
  0x68   : > { %p50_p9 = scmp.ge.s32.totalorder %s3333_s19, 2  ;;  %p69_p4 = scmp.eq.s32.totalorder %s2758_s1, 0 }
  0x69   : > { %p2772_p2 = por %p3270_p12, %p62_p5  ;;  %p3274_p3 = scmp.ne.s32.totalorder %s2451_s30, %s2447_s29 }
  0x6a   : > { %s3335_s19 = smov (%p50_p9, %s3333_s19), 0  ;;  %p2782_p0 = por %p69_p4, %p68_p10 }
  0x6b   : > { %3272 = sst [smem:[#allocation28_spill]] %s3335_s19  ;;  %p2789_p1 = por %p3274_p3, %p69_p4 }
  0x6c   : > { %s3273_s25 = scalar_select %p2782_p0, 1, 0 }
  0x6d   : > { %s3275_s24 = scalar_select %p2789_p1, 1, 0 }
  0x6e   : > { %s52_s15 = ssub.s32 %s2483_s22, %s3335_s19  ;;  %p430_p8 = scmp.eq.s32.totalorder %s2758_s1, 3 }
  0x6f   : > { %3276 = sst [smem:[#allocation29_spill]] %s3275_s24  ;;  %p53_p6 = scmp.eq.s32.totalorder %s52_s15, 0 }
  0x70   : > { %p436_p7 = scmp.eq.s32.totalorder %s1865_s5, 3  ;;  %p2796_p9 = por %p430_p8, %p62_p5 }
  0x71   : > { %s456_s13 = sand.u32 1, %s2467_s18   ;;  %s1869_s7 = sshll.u32 %s2483_s22, 7 }
  0x72   : > { %s3277_s28 = scalar_select %p2796_p9, 1, 0 }
  0x73   : > { %s2802_s2 = scalar_select %p53_p6, %s2467_s18, %s55_s27  }
  0x74   : > { %p2807_p12 = por %p436_p7, %p68_p10  ;;  %s1868_s29 = sshll.u32 %s456_s13, 3 }
  0x75   : > { %3278 = sst [smem:[#allocation30_spill]] %s2802_s2  ;;  %s460_s5 = scalar_lea.vmem [#allocation3], %s1868_s29 }
  0x76   : > { %s3279_s3 = scalar_select %p2807_p12, 1, 0 }
  0x77   : > { %s3281_s0 = sld [smem:[#allocation32_spill]]  ;;  %s467_s15 = sshll.u32 %s460_s5, 4  ;;  %s2825_s15 = int_to_ptr.vmem [resolvable:$true] %s467_s15 }
  0x78   : > { %3280 = sst [smem:[#allocation31_spill]] %s3279_s3  ;;  %p3282_p5 = scmp.lt.s32.totalorder %s2487_s23, 4 }
  0x79   : > { %s3284_s6 = sld [smem:[#allocation38_spill]]  ;;  %s457_s24 = scalar_lea.sflag [#allocation4], %s456_s13 }
  0x7a   : > { %p2821_p4 = pnand %p3282_p5, %p2772_p2 }
  0x7c   : > { %p2269_p3 = pneg %p2821_p4 }
  0x7d   : > { %s2815_s19 = scalar_lea.hbm %s3281_s0, %s1869_s7  ;;  %s2272_s5 = scalar_lea.hbm %s3281_s0, 256 }
  0x7e   : > { %s2267_s2 = scalar_lea.hbm %s2815_s19, 128  ;;  %p2273_p6 = scmp.lt.u32.totalorder %s2815_s19, %s3281_s0 }
  0x7f   : > { %s2831_s7 = scalar_lea.hbm %s3284_s6, %s2669_s12  ;;  %p2268_p10 = scmp.ne.s32.totalorder %s2815_s19, %s2267_s2 }
  0x80   : > { %p2274_p7 = scmp.lt.u32.totalorder %s2272_s5, %s2267_s2  ;;  %p2276_p12 = scmp.lt.u32.totalorder %s2267_s2, %s2815_s19 }
  0x81   : > { %p2270_p2 = pnand %p2269_p3, %p2268_p10 }
  0x82   : > { %p2275_p5 = por %p2274_p7, %p2273_p6 }
  0x83   : > { %p2271_p8 = pneg %p2270_p2 }
  0x84   : > { %p2277_p9 = por %p2276_p12, %p2275_p5 }
  0x86   : > { %p2278_p1 = pnand %p2277_p9, %p2271_p8 }
  0x88   : > { %2281 = shalt.err (!%p2278_p1)
}
  0x89   : > { %s2282_s22 = scalar_lea.vmem %s2825_s15, 128  ;;  %s2491_s13 = smov [#allocation3]  }
  0x8a   : > { %p2283_p10 = scmp.ne.s32.totalorder %s2825_s15, %s2282_s22  ;;  %s2287_s20 = sshll.u32 %s2491_s13, 4  ;;  %s2288_s20 = int_to_ptr.vmem [resolvable:$false] %s2287_s20 }
  0x8b   : > { %s2289_s18 = scalar_lea.vmem %s2288_s20, 256  ;;  %p2290_p13 = scmp.lt.s32.totalorder %s2825_s15, %s2288_s20 }
  0x8c   : > { %p2285_p2 = pnand %p2283_p10, %p2269_p3  ;;  %p2291_p6 = scmp.lt.s32.totalorder %s2289_s18, %s2282_s22 }
  0x8e   : > { %p2286_p0 = pneg %p2285_p2  ;;  %p2292_p7 = por %p2291_p6, %p2290_p13 }
  0x90   : > { %p2293_p12 = pnand %p2292_p7, %p2286_p0 }
  0x92   : > { %2296 = shalt.err (!%p2293_p12)
}
  0x93   : > { %2054 = dma.hbm_to_vmem [thread:$0]  (!%p2821_p4), %s2815_s19, 128, %s2825_s15, %s457_s24  }
  0x94   : > { %s522_s2 = scalar_lea.vmem [#allocation8], %s2663_s14  ;;  %s3285_s9 = sld [smem:[#allocation41_spill]] }
  0x95   : > { %s529_s3 = sshll.u32 %s522_s2, 4  ;;  %s2297_s22 = scalar_lea.hbm %s2831_s7, 16  ;;  %s530_s3 = int_to_ptr.vmem [resolvable:$true] %s529_s3 }
  0x96   : > { %p2298_p13 = scmp.ne.s32.totalorder %s2831_s7, %s2297_s22  ;;  %s2302_s20 = scalar_lea.hbm %s3284_s6, 32 }
  0x97   : > { %p2303_p9 = scmp.lt.u32.totalorder %s2831_s7, %s3284_s6  ;;  %p2304_p4 = scmp.lt.u32.totalorder %s2302_s20, %s2297_s22 }
  0x98   : > { %p2300_p0 = pnand %p2298_p13, %p2696_p11  ;;  %p2306_p8 = scmp.lt.u32.totalorder %s2297_s22, %s2831_s7 }
  0x99   : > { %p2305_p3 = por %p2304_p4, %p2303_p9 }
  0x9a   : > { %s2863_s5 = scalar_lea.hbm %s3285_s9, %s2669_s12  ;;  %p2301_p1 = pneg %p2300_p0 }
  0x9b   : > { %p2307_p5 = por %p2306_p8, %p2305_p3 }
  0x9d   : > { %p2308_p10 = pnand %p2307_p5, %p2301_p1 }
  0x9f   : > { %2311 = shalt.err (!%p2308_p10)
}
  0xa0   : > { %s2312_s12 = scalar_lea.vmem %s530_s3, 16  ;;  %s2492_s19 = smov [#allocation8]  }
  0xa1   : > { %p2313_p2 = scmp.ne.s32.totalorder %s530_s3, %s2312_s12  ;;  %s2317_s15 = sshll.u32 %s2492_s19, 4  ;;  %s2318_s15 = int_to_ptr.vmem [resolvable:$false] %s2317_s15 }
  0xa2   : > { %s2319_s24 = scalar_lea.vmem %s2318_s15, 32  ;;  %p2320_p12 = scmp.lt.s32.totalorder %s530_s3, %s2318_s15 }
  0xa3   : > { %p2315_p6 = pnand %p2313_p2, %p2696_p11  ;;  %p2321_p13 = scmp.lt.s32.totalorder %s2319_s24, %s2312_s12 }
  0xa5   : > { %p2316_p7 = pneg %p2315_p6  ;;  %p2322_p0 = por %p2321_p13, %p2320_p12 }
  0xa7   : > { %p2323_p4 = pnand %p2322_p0, %p2316_p7 }
  0xa9   : > { %2326 = shalt.err (!%p2323_p4)
}
  0xaa   : > { %p3286_p9 = scmp.ne.s32.totalorder %s3261_s26, 0  ;;  %s564_s0 = scalar_lea.vmem [#allocation11], %s2663_s14 }
  0xab   : > { %s571_s2 = sshll.u32 %s564_s0, 4  ;;  %s2327_s11 = scalar_lea.hbm %s2863_s5, 16  ;;  %s572_s2 = int_to_ptr.vmem [resolvable:$true] %s571_s2 }
  0xac   : > { %2060 = dma.hbm_to_vmem [thread:$0]  (!%p3286_p9), %s2831_s7, 16, %s530_s3, %s2690_s10  }
  0xad   : > { %p2328_p1 = scmp.ne.s32.totalorder %s2863_s5, %s2327_s11  ;;  %s2332_s27 = scalar_lea.hbm %s3285_s9, 32 }
  0xae   : > { %p2333_p5 = scmp.lt.u32.totalorder %s2863_s5, %s3285_s9  ;;  %p2334_p10 = scmp.lt.u32.totalorder %s2332_s27, %s2327_s11 }
  0xaf   : > { %p2330_p3 = pnand %p2328_p1, %p2696_p11  ;;  %p2336_p6 = scmp.lt.u32.totalorder %s2327_s11, %s2863_s5 }
  0xb0   : > { %p2335_p2 = por %p2334_p10, %p2333_p5 }
  0xb1   : > { %p2331_p8 = pneg %p2330_p3 }
  0xb2   : > { %p2337_p7 = por %p2336_p6, %p2335_p2 }
  0xb4   : > { %p2338_p12 = pnand %p2337_p7, %p2331_p8 }
  0xb6   : > { %2341 = shalt.err (!%p2338_p12)
}
  0xb7   : > { %s2342_s14 = scalar_lea.vmem %s572_s2, 16  ;;  %s2493_s10 = smov [#allocation11]  }
  0xb8   : > { %p2343_p13 = scmp.ne.s32.totalorder %s572_s2, %s2342_s14  ;;  %s2347_s7 = sshll.u32 %s2493_s10, 4  ;;  %s2348_s7 = int_to_ptr.vmem [resolvable:$false] %s2347_s7 }
  0xb9   : > { %s2349_s3 = scalar_lea.vmem %s2348_s7, 32  ;;  %p2350_p1 = scmp.lt.s32.totalorder %s572_s2, %s2348_s7 }
  0xba   : > { %p2345_p0 = pnand %p2343_p13, %p2696_p11  ;;  %p2351_p3 = scmp.lt.s32.totalorder %s2349_s3, %s2342_s14 }
  0xbc   : > { %p2346_p4 = pneg %p2345_p0  ;;  %p2352_p9 = por %p2351_p3, %p2350_p1 }
  0xbe   : > { %p2353_p5 = pnand %p2352_p9, %p2346_p4 }
  0xc0   : > { %2356 = shalt.err (!%p2353_p5)
}
  0xc1   : > { %p3287_p10 = scmp.ne.s32.totalorder %s3261_s26, 0  ;;  %p3288_p8 = scmp.ne.s32.totalorder %s3265_s4, 0 }
  0xc2   : > { %s2905_s21 = sand.u32 (!%p3288_p8), 1, %s2463_s17   ;;  %p3289_p11 = scmp.ne.s32.totalorder (!%p3288_p8), %s3273_s25, 0 }
  0xc3   : > { %2066 = dma.hbm_to_vmem [thread:$0]  (!%p3287_p10), %s2863_s5, 16, %s572_s2, %s2737_s8  }
  0xc4   : > { %606 = sbr.rel (%p3288_p8) target bundleno = 2807 (0xaf7), region = 76  ;;  %s3229_s18 = sshll.u32 (!%p3288_p8), %s2905_s21, 3 }
  0xc5   : > { %s609_s12 = scalar_lea.sflag (!%p3288_p8), [#allocation4], %s2905_s21  ;;  %s2911_s19 = scalar_lea.vmem (!%p3288_p8), [#allocation3], %s3229_s18 }
  0xcb   : > { %2430 = dma.done.wait (%p3289_p11), %s609_s12, 128  }
  0xcc   : > { %2432 = vsyncadd (%p3289_p11), %s609_s12, 4294967168  ;;  %s3290_s26 = sld [smem:[#allocation29_spill]]  ;;  %s617_s4 = sand.u32 1, %s2758_s1  }
  0xcd   : > { %s2919_s8 = sand.u32 1, %s2451_s30   ;;  %s618_s5 = scalar_lea.sflag [#allocation7], %s617_s4 }
  0xd2   : > { %p3291_p9 = scmp.ne.s32.totalorder %s3290_s26, 0 }
  0xd4   : > { %2434 = dma.done.wait (%p3291_p9), %s618_s5, 32  }
  0xd5   : > { %2436 = vsyncadd (%p3291_p9), %s618_s5, 4294967264  ;;  %s634_s25 = scalar_lea.sflag [#allocation10], %s617_s4 }
  0xd6   : > { %2438 = dma.done.wait (%p3291_p9), %s634_s25, 32  }
  0xd7   : > { %2440 = vsyncadd (%p3291_p9), %s634_s25, 4294967264  ;;  %s3292_s1 = sld [smem:[#allocation23_spill]]  ;;  %s3293_s2 = sld [smem:[#allocation22_spill]] }
  0xd8   : > { %s3296_s4 = sld [smem:[#allocation34_spill]]  ;;  %s3297_s24 = sld [smem:[#allocation36_spill]] }
  0xd9   : > { %s3298_s18 = sld [smem:[#allocation40_spill]]  ;;  %s3299_s17 = sld [smem:[#allocation42_spill]] }
  0xda   : > { %s3300_s12 = sld [smem:[#allocation43_spill]]  ;;  %s3301_s0 = sld [smem:[#allocation44_spill]] }
  0xdb   : > { %s3302_s16 = sld [smem:[#allocation45_spill]] }
  0xdd   : > { %p740_p2 = scmp.lt.s32.totalorder %s3292_s1, 1  ;;  %p743_p6 = scmp.lt.s32.totalorder %s3293_s2, 1 }
  0xde   : > { %p1885_p7 = scmp.ne.s32.totalorder %s3293_s2, 0 }
  0xdf   : > { %s3337_s1 = smov (!%p740_p2, %s3292_s1), 1  ;;  %v780_v0 = vld [vmem:[%s2911_s19] sm:$0xff] (!%p1885_p7)  ;;  %vm781_vm0 = vcmask (!%p1885_p7), 261120  }
  0xe0   : > { %s2938_s11 = scalar_select %p743_p6, %s3293_s2, 1 }
  0xe2   : > { %s1921_s20 = sshll.u32 %s2938_s11, 4  ;;  %s1924_s27 = sshll.u32 %s2938_s11, 5 }
  0xe3   : > { %s747_s5 = scalar_lea.vmem %s3296_s4, %s1921_s20  ;;  %s2955_s29 = scalar_lea.vmem %s3297_s24, %s1921_s20 }
  0xe4   : > { %s2960_s6 = scalar_lea.vmem %s3298_s18, %s1921_s20  ;;  %s2966_s14 = scalar_lea.vmem %s3299_s17, %s1924_s27 }
  0xe5   : > { %s768_s26 = scalar_lea.vmem %s3300_s12, %s2938_s11  ;;  %s771_s24 = scalar_lea.vmem %s3301_s0, %s2938_s11 }
  0xe6   : > { %s774_s15 = scalar_lea.vmem %s3302_s16, %s2938_s11  ;;  %s644_s18 = scalar_lea.vmem [#allocation11], %s2919_s8 }
  0xe7   : > { %s3303_s20 = sshll.u32 %s2905_s21, 3  ;;  %779 = sbr.rel (%p1885_p7) target bundleno = 238 (0xee), region = 100 }
  0xe8   : > { %s2983_s22 = scalar_lea.vmem [#allocation12], %s3303_s20 }
  0xe9   : > { %782 = vst.msk [vmem:[%s2983_s22] sm:$0xff] (!%p1885_p7), %vm781_vm0, %v780_v0 }
  0xee PF: > { %v2177_v1 = vld [vmem:[%s747_s5] sm:$0xff]   ;;  %v2494_v2 = vmov 0.0   ;;  %v2178_v3 = vld [vmem:[%s747_s5 + $0x8] sm:$0xff]   ;;  %vm2495_vm1 = vmmov 0   ;;  %vm808_vm2 = vcmask 261120   ;;  %s3304_s16 = sld [smem:[#allocation35_spill]] }
  0xef   : > { %1955 = vmatprep.subr.bf16.mxu0 %v2494_v2  ;;  %1963 = vmatprep.subr.bf16.mxu1 %v2494_v2  ;;  %s2496_s19 = smov 120   ;;  %s2497_s2 = smov 96   ;;  %vm863_vm3 = vcmask 64512   ;;  %vm927_vm4 = vcmask 1043456   ;;  %vm1086_vm5 = vcmask 130112   ;;  %vm1202_vm6 = vcmask 195712  }
  0xf0   : > { %1956 = vmatpush3.bf16.msra.mxu0 %v2177_v1  ;;  %1959 = vmatprep.mubr.msk.bf16.mxu0 %vm2495_vm1, %v2494_v2  ;;  %v2993_v4 = vld [vmem:[%s2983_s22] sm:$0xff]  ;;  %s2498_s13 = smov 80   ;;  %s2499_s3 = smov 88   ;;  %vm1318_vm7 = vcmask 261312   ;;  %vm1527_vm8 = vcmask 523264  }
  0xf1   : > { %1957 = vmatprep.subr.bf16.mxu0 %v2494_v2  ;;  %1965 = vmatprep.mubr.msk.bf16.mxu1 %vm2495_vm1, %v2494_v2  ;;  %v784_v5 = vpack.c.bf16 %v2993_v4, %v2993_v4  ;;  %s2500_s5 = smov 72   ;;  %s2501_s27 = smov 112  }
  0xf2   : > { %s2502_s10 = smov 104   ;;  %s3306_s4 = sld [smem:[#allocation33_spill]] }
  0xf3   : > { %s2504_s25 = smov 64   ;;  %s2505_s20 = smov 40  }
  0xf4   : > { %1958 = vmatpush3.bf16.msra.mxu0 %v2178_v3  ;;  %s3305_s17 = scalar_lea.vmem %s3304_s16, %s2938_s11  ;;  %s2506_s9 = smov 48  }
  0xf5   : > { %1969 = vmatprep.subr.bf16.mxu0 %v2494_v2  ;;  %v1886_v6 = vld [vmem:[%s3305_s17] ss:$0 sm:$0xff]  ;;  %s2507_s30 = smov 8   ;;  %s2508_s16 = smov 16  }
  0xf6   : > { %s2509_s17 = smov 24   ;;  %s1616_s12 = sshll.u32 %s2983_s22, 4  ;;  %s3130_s12 = int_to_ptr.vmem [resolvable:$true] %s1616_s12 }
  0xf7   : > { %1960 = vmatmul.mubr.msk.bf16.vlgmr.msra.gmra.mrb[0].mxu0 %vm808_vm2, %v784_v5  ;;  %p3316_p13 = scmp.ne.s32.totalorder %s3277_s28, 0  ;;  %s2510_s11 = smov [#allocation12]  }
  0xf8   : > { %1971 = vmatprep.mubr.msk.bf16.mxu0 %vm2495_vm1, %v2494_v2  ;;  %s3307_s0 = scalar_lea.vmem %s3306_s4, %s3337_s1  ;;  %s2503_s1 = smov 56  }
  0xf9   : > { %v1890_v24 = vld [vmem:[%s3307_s0] ss:$0 sm:$0xff] }
 0x1ca   : > { %v846_v7 = vpop.f32.mrb[0].mxu0 }
 0x1cb   : > { %v847_v8 = vadd.f32 %v1886_v6, %v846_v7  ;;  %v1961_v9 = vpop.f32.mrb[1].mxu0 }
 0x1cc   : > { %v849_v10 = vpop.f32.mrb[2].mxu0 }
 0x1cd   : > { %v3009_v11 = vpack.c.bf16 %v847_v8, %v847_v8  ;;  %v1962_v12 = vpop.f32.mrb[3].mxu0 }
 0x1cf   : > { %972 = vrot.lane.b32.xlu1 %v3009_v11, %s2496_s19  ;;  %861 = vrot.lane.b32.xlu0 %v3009_v11, %s2497_s2  ;;  %s3309_s19 = scalar_lea.vmem [#allocation8], %s2919_s8 }
 0x1d3   : > { %1090 = vrot.lane.b32.xlu1 %v3009_v11, %s2498_s13  ;;  %974 = vrot.lane.b32.xlu0 %v3009_v11, %s2499_s3 }
 0x1d7   : > { %1206 = vrot.lane.b32.xlu1 %v3009_v11, %s2500_s5  ;;  %1088 = vrot.lane.b32.xlu0 %v3009_v11, %s2501_s27 }
 0x1db   : > { %1204 = vrot.lane.b32.xlu0 %v3009_v11, %s2502_s10 }
 0x241   : > { %v862_v13 = vpop.permute.xlu0 %861  ;;  %v973_v16 = vpop.permute.xlu1 %972 }
 0x242   : > { %v868_v14 = vsel %vm863_vm3, %v862_v13, 0 }
 0x243   : > { %1964 = vmatpush3.bf16.xpose.msra.mxu1 %v868_v14 }
 0x244   : > { %1975 = vmatprep.subr.bf16.mxu1 %v2494_v2 }
 0x245   : > { %v975_v15 = vpop.permute.xlu0 %974  ;;  %v1091_v18 = vpop.permute.xlu1 %1090 }
 0x246   : > { %v980_v17 = vsel %vm863_vm3, %v975_v15, 0  ;;  %v1096_v19 = vsel %vm863_vm3, %v1091_v18, 0 }
 0x249   : > { %v1207_v20 = vpop.permute.xlu1 %1206  ;;  %v1089_v21 = vpop.permute.xlu0 %1088 }
 0x24a   : > { %1966 = vmatmul.mubr.msk.bf16.vlgmr.msra.gmra.mrb[0].mxu1 %vm863_vm3, %v3009_v11  ;;  %v1212_v22 = vsel %vm863_vm3, %v1207_v20, 0 }
 0x24b   : > { %1976 = vmatpush3.bf16.xpose.msra.mxu1 %v980_v17  ;;  %1977 = vmatprep.mubr.msk.bf16.mxu1 %vm2495_vm1, %v2494_v2 }
 0x24c   : > { %1987 = vmatprep.subr.bf16.mxu1 %v2494_v2 }
 0x24d   : > { %v1205_v23 = vpop.permute.xlu0 %1204 }
 0x252   : > { %1978 = vmatmul.mubr.msk.bf16.vlgmr.msra.gmra.mrb[4].mxu1 %vm863_vm3, %v973_v16 }
 0x253   : > { %1988 = vmatpush3.bf16.xpose.msra.mxu1 %v1096_v19  ;;  %1989 = vmatprep.mubr.msk.bf16.mxu1 %vm2495_vm1, %v2494_v2 }
 0x254   : > { %1999 = vmatprep.subr.bf16.mxu1 %v2494_v2 }
 0x25a   : > { %1990 = vmatmul.mubr.msk.bf16.vlgmr.msra.gmra.mrb[8].mxu1 %vm863_vm3, %v1089_v21 }
 0x25b   : > { %2000 = vmatpush3.bf16.xpose.msra.mxu1 %v1212_v22  ;;  %2001 = vmatprep.mubr.msk.bf16.mxu1 %vm2495_vm1, %v2494_v2 }
 0x25c   : > { %2011 = vmatprep.subr.bf16.mxu1 %v2494_v2 }
 0x262   : > { %2002 = vmatmul.mubr.msk.bf16.vlgmr.msra.gmra.mrb[12].mxu1 %vm863_vm3, %v1205_v23 }
 0x263   : > { %2015 = vmatprep.mubr.msk.bf16.mxu1 %vm2495_vm1, %v2494_v2 }
 0x31d   : > { %v904_v25 = vpop.f32.mrb[0].mxu1 }
 0x31e   : > { %v905_v26 = vadd.f32 %v1890_v24, %v904_v25  ;;  %v1967_v27 = vpop.f32.mrb[1].mxu1 }
 0x31f   : > { %v907_v28 = vpop.f32.mrb[2].mxu1 }
 0x320   : > { %v1968_v29 = vpop.f32.mrb[3].mxu1  ;;  %v910_v30 = vsel %vm863_vm3, %v905_v26, -inf }
 0x321   : > { %911 = vmax.xlane.f32.xlu1 %v910_v30 }
 0x325   : > { %v1016_v31 = vpop.f32.mrb[4].mxu1 }
 0x326   : > { %v1017_v32 = vadd.f32 %v1890_v24, %v1016_v31  ;;  %v1979_v33 = vpop.f32.mrb[5].mxu1 }
 0x327   : > { %v1019_v34 = vpop.f32.mrb[6].mxu1 }
 0x328   : > { %v1980_v35 = vpop.f32.mrb[7].mxu1  ;;  %v1022_v36 = vsel %vm863_vm3, %v1017_v32, -inf }
 0x329   : > { %1023 = vmax.xlane.f32.xlu0 %v1022_v36 }
 0x32d   : > { %v1132_v37 = vpop.f32.mrb[8].mxu1 }
 0x32e   : > { %v1133_v38 = vadd.f32 %v1890_v24, %v1132_v37  ;;  %v1991_v39 = vpop.f32.mrb[9].mxu1 }
 0x32f   : > { %v1135_v40 = vpop.f32.mrb[10].mxu1  ;;  %v2179_v39 = vld [vmem:[%s2955_s29] sm:$0xff]  }
 0x330   : > { %v1992_v41 = vpop.f32.mrb[11].mxu1  ;;  %v1138_v42 = vsel %vm863_vm3, %v1133_v38, -inf  ;;  %2012 = vmatpush3.bf16.msra.mxu1 %v2179_v39  ;;  %v2180_v40 = vld [vmem:[%s2955_s29 + $0x8] sm:$0xff]   ;;  %s3308_s29 = scalar_lea.vmem [#allocation6], %s2919_s8 }
 0x331   : > { %1139 = vmax.xlane.f32.xlu0 %v1138_v42  ;;  %2013 = vmatprep.subr.bf16.mxu1 %v2494_v2 }
 0x334   : > { %2014 = vmatpush3.bf16.msra.mxu1 %v2180_v40 }
 0x335   : > { %v1248_v43 = vpop.f32.mrb[12].mxu1  ;;  %2027 = vmatprep.subr.bf16.mxu1 %v2494_v2 }
 0x336   : > { %v1249_v44 = vadd.f32 %v1890_v24, %v1248_v43  ;;  %v2003_v45 = vpop.f32.mrb[13].mxu1 }
 0x337   : > { %v1251_v46 = vpop.f32.mrb[14].mxu1 }
 0x338   : > { %v2004_v47 = vpop.f32.mrb[15].mxu1  ;;  %v1254_v48 = vsel %vm863_vm3, %v1249_v44, -inf }
 0x339   : > { %1255 = vmax.xlane.f32.xlu1 %v1254_v48 }
 0x3ae   : > { %v912_v49 = vpop.xlane.xlu1 %911 }
 0x3af   : > { %v913_v50 = vsub.f32 %v905_v26, %v912_v49 }
 0x3b1   : > { %v914_v51 = vmul.f32 1.442695, %v913_v50 }
 0x3b3   : > { %2187 = vpow2.f32 %v914_v51 }
 0x3b6   : > { %v1024_v52 = vpop.xlane.xlu0 %1023 }
 0x3b7   : > { %v1025_v53 = vsub.f32 %v1017_v32, %v1024_v52 }
 0x3b9   : > { %v1026_v54 = vmul.f32 1.442695, %v1025_v53 }
 0x3bb   : > { %2189 = vpow2.f32 %v1026_v54  ;;  %v1899_v54 = vld [vmem:[%s3308_s29] ss:$0 sm:$0xff] }
 0x3bd   : > { %v2188_v55 = vpop.eup %2187 }
 0x3be   : > { %v1140_v56 = vpop.xlane.xlu0 %1139  ;;  %v916_v57 = vsel %vm863_vm3, %v2188_v55, 0.0 }
 0x3bf   : > { %v1141_v58 = vsub.f32 %v1133_v38, %v1140_v56  ;;  %917 = vadd.xlane.f32.xlu0 %v916_v57 }
 0x3c1   : > { %v1142_v59 = vmul.f32 1.442695, %v1141_v58 }
 0x3c3   : > { %2191 = vpow2.f32 %v1142_v59 }
 0x3c5   : > { %v2190_v60 = vpop.eup %2189 }
 0x3c6   : > { %v1028_v61 = vsel %vm863_vm3, %v2190_v60, 0.0  ;;  %v1256_v0 = vpop.xlane.xlu1 %1255 }
 0x3c7   : > { %1029 = vadd.xlane.f32.xlu1 %v1028_v61  ;;  %v1257_v1 = vsub.f32 %v1249_v44, %v1256_v0 }
 0x3c9   : > { %v1258_v3 = vmul.f32 1.442695, %v1257_v1 }
 0x3cb   : > { %2193 = vpow2.f32 %v1258_v3 }
 0x3cd   : > { %v2192_v62 = vpop.eup %2191 }
 0x3ce   : > { %v1144_v63 = vsel %vm863_vm3, %v2192_v62, 0.0 }
 0x3cf   : > { %1145 = vadd.xlane.f32.xlu0 %v1144_v63 }
 0x3d5   : > { %v2194_v5 = vpop.eup %2193 }
 0x3d6   : > { %v1260_v6 = vsel %vm863_vm3, %v2194_v5, 0.0 }
 0x3d8   : > { %1034 = vrot.lane.b32.xlu1 %v3009_v11, %s2503_s1  ;;  %s3315_s1 = sld [smem:[#allocation46_spill]] }
 0x3e5   : > { %922 = vrot.lane.b32.xlu0 %v3009_v11, %s2504_s25 }
 0x3e9   : > { %1266 = vrot.lane.b32.xlu0 %v3009_v11, %s2505_s20  ;;  %s2357_s20 = scalar_lea.vmem %s3130_s12, 128 }
 0x3ea   : > { %p2358_p12 = scmp.ne.s32.totalorder %s3130_s12, %s2357_s20 }
 0x3ec   : > { %p2359_p0 = pnand %p2358_p12, %p3316_p13 }
 0x3ee   : > { %p2360_p4 = pneg %p2359_p0 }
 0x3fc   : > { %1261 = vadd.xlane.f32.xlu1 %v1260_v6  ;;  %v2182_v6 = vld [vmem:[%s2960_s6 + $0x8] sm:$0xff]  }
 0x40d   : > { %1150 = vrot.lane.b32.xlu1 %v3009_v11, %s2506_s9 }
 0x44c   : > { %v918_v7 = vpop.xlane.xlu0 %917 }
 0x44d   : > { %2195 = vrcp.f32 %v918_v7  ;;  %v2184_v7 = vld [vmem:[%s2966_s14 + $0x8] sm:$0xff]  }
 0x454   : > { %v1030_v8 = vpop.xlane.xlu1 %1029 }
 0x455   : > { %2197 = vrcp.f32 %v1030_v8 }
 0x457   : > { %v2196_v9 = vpop.eup %2195 }
 0x458   : > { %v920_v12 = vmul.f32 %v2196_v9, %v2188_v55  ;;  %v1035_v15 = vpop.permute.xlu1 %1034 }
 0x459   : > { %v1040_v18 = vsel %vm927_vm4, %v1035_v15, 0 }
 0x45a   : > { %v921_v16 = vpack.c.bf16 %v920_v12, %v920_v12 }
 0x45c   : > { %v1146_v10 = vpop.xlane.xlu0 %1145 }
 0x45d   : > { %2199 = vrcp.f32 %v1146_v10 }
 0x45f   : > { %v2198_v17 = vpop.eup %2197 }
 0x460   : > { %v923_v13 = vpop.permute.xlu0 %922  ;;  %v1032_v11 = vmul.f32 %v2198_v17, %v2190_v60 }
 0x461   : > { %v929_v14 = vsel %vm927_vm4, %v923_v13, 0  ;;  %v1903_v13 = vld [vmem:[%s3309_s19] ss:$0 sm:$0xff] }
 0x462   : > { %1970 = vmatpush3.bf16.msra.mxu0 %v929_v14  ;;  %v1033_v19 = vpack.c.bf16 %v1032_v11, %v1032_v11  ;;  %v2185_v11 = vld [vmem:[%s2966_s14 + $0x10] sm:$0xff]  }
 0x463   : > { %1981 = vmatprep.subr.bf16.mxu0 %v2494_v2 }
 0x464   : > { %v1267_v25 = vpop.permute.xlu0 %1266 }
 0x465   : > { %1972 = vmatmul.mubr.msk.bf16.vlgmr.msra.gmra.mrb[4].mxu0 %vm863_vm3, %v921_v16  ;;  %v1272_v27 = vsel %vm927_vm4, %v1267_v25, 0 }
 0x466   : > { %1982 = vmatpush3.bf16.msra.mxu0 %v1040_v18  ;;  %1983 = vmatprep.mubr.msk.bf16.mxu0 %vm2495_vm1, %v2494_v2 }
 0x467   : > { %1993 = vmatprep.subr.bf16.mxu0 %v2494_v2  ;;  %v2200_v20 = vpop.eup %2199 }
 0x468   : > { %v1148_v22 = vmul.f32 %v2200_v20, %v2192_v62  ;;  %v1905_v20 = vld [vmem:[%s644_s18] ss:$0 sm:$0xff] }
 0x46a   : > { %v1149_v26 = vpack.c.bf16 %v1148_v22, %v1148_v22 }
 0x46d   : > { %1984 = vmatmul.mubr.msk.bf16.vlgmr.msra.gmra.mrb[8].mxu0 %vm863_vm3, %v1033_v19  ;;  %v2186_v19 = vld [vmem:[%s2966_s14 + $0x18] sm:$0xff]  }
 0x46e   : > { %1995 = vmatprep.mubr.msk.bf16.mxu0 %vm2495_vm1, %v2494_v2 }
 0x489   : > { %v1262_v21 = vpop.xlane.xlu1 %1261 }
 0x48a   : > { %2201 = vrcp.f32 %v1262_v21 }
 0x48d   : > { %v1151_v23 = vpop.permute.xlu1 %1150 }
 0x48e   : > { %v1156_v24 = vsel %vm927_vm4, %v1151_v23, 0 }
 0x48f   : > { %1994 = vmatpush3.bf16.msra.mxu0 %v1156_v24 }
 0x490   : > { %2005 = vmatprep.subr.bf16.mxu0 %v2494_v2 }
 0x492   : > { %1996 = vmatmul.mubr.msk.bf16.vlgmr.msra.gmra.mrb[12].mxu0 %vm863_vm3, %v1149_v26 }
 0x493   : > { %2006 = vmatpush3.bf16.msra.mxu0 %v1272_v27  ;;  %2007 = vmatprep.mubr.msk.bf16.mxu0 %vm2495_vm1, %v2494_v2 }
 0x494   : > { %v2202_v28 = vpop.eup %2201  ;;  %2019 = vmatprep.subr.bf16.mxu0 %v2494_v2 }
 0x495   : > { %v1264_v29 = vmul.f32 %v2202_v28, %v2194_v5  ;;  %v2181_v5 = vld [vmem:[%s2960_s6] sm:$0xff]   ;;  %s3310_s6 = scalar_lea.vmem [#allocation9], %s2919_s8  ;;  %s3312_s8 = sld [smem:[#allocation23_spill]] }
 0x496   : > { %v1904_v15 = vld [vmem:[%s3310_s6] ss:$0 sm:$0xff] }
 0x497   : > { %v1265_v30 = vpack.c.bf16 %v1264_v29, %v1264_v29  ;;  %v1909_v28 = vld [vmem:[%s768_s26] ss:$0 sm:$0xff] }
 0x49a   : > { %2008 = vmatmul.mubr.msk.bf16.vlgmr.msra.gmra.mrb[16].mxu0 %vm863_vm3, %v1265_v30 }
 0x49b   : > { %2023 = vmatprep.mubr.msk.bf16.mxu0 %vm2495_vm1, %v2494_v2  ;;  %2020 = vmatpush3.bf16.msra.mxu0 %v2181_v5  ;;  %s1918_s7 = sshll.u32 %s3312_s8, 7 }
 0x49c   : > { %2021 = vmatprep.subr.bf16.mxu0 %v2494_v2  ;;  %s3128_s25 = scalar_lea.hbm %s3315_s1, %s1918_s7 }
 0x49f   : > { %2022 = vmatpush3.bf16.msra.mxu0 %v2182_v6 }
 0x538   : > { %v965_v31 = vpop.f32.mrb[4].mxu0 }
 0x539   : > { %971 = vst.msk [vmem:[#allocation2] sm:$0xff] %vm863_vm3, %v965_v31  ;;  %v1973_v32 = vpop.f32.mrb[5].mxu0 }
 0x53a   : > { %v968_v33 = vpop.f32.mrb[6].mxu0 }
 0x53b   : > { %v1974_v34 = vpop.f32.mrb[7].mxu0 }
 0x540   : > { %v1076_v35 = vpop.f32.mrb[8].mxu0 }
 0x541   : > { %1083 = vrot.lane.b32.xlu1 %v1076_v35, %s2507_s30  ;;  %v1985_v36 = vpop.f32.mrb[9].mxu0 }
 0x542   : > { %v1079_v37 = vpop.f32.mrb[10].mxu0 }
 0x543   : > { %v1986_v38 = vpop.f32.mrb[11].mxu0 }
 0x565   : > { %v1192_v41 = vpop.f32.mrb[12].mxu0 }
 0x566   : > { %1199 = vrot.lane.b32.xlu0 %v1192_v41, %s2508_s16  ;;  %v1997_v42 = vpop.f32.mrb[13].mxu0 }
 0x567   : > { %v1195_v43 = vpop.f32.mrb[14].mxu0 }
 0x568   : > { %v1998_v44 = vpop.f32.mrb[15].mxu0 }
 0x569   : > { %v1915_v44 = vld [vmem:[%s771_s24] ss:$0 sm:$0xff]  ;;  %s1603_s24 = scalar_lea.sflag [#allocation5], %s2905_s21 }
 0x56d   : > { %v1308_v45 = vpop.f32.mrb[16].mxu0 }
 0x56e   : > { %1315 = vrot.lane.b32.xlu1 %v1308_v45, %s2509_s17  ;;  %v2009_v46 = vpop.f32.mrb[17].mxu0 }
 0x56f   : > { %v1311_v47 = vpop.f32.mrb[18].mxu0  ;;  %v1916_v46 = vld [vmem:[%s774_s15] ss:$0 sm:$0xff]  ;;  %s2361_s15 = sshll.u32 %s2510_s11, 4  ;;  %s2362_s15 = int_to_ptr.vmem [resolvable:$false] %s2361_s15 }
 0x570   : > { %v2010_v48 = vpop.f32.mrb[19].mxu0  ;;  %s2363_s9 = scalar_lea.vmem %s2362_s15, 256  ;;  %p2364_p1 = scmp.lt.s32.totalorder %s3130_s12, %s2362_s15 }
 0x571   : > { %p2365_p3 = scmp.lt.s32.totalorder %s2363_s9, %s2357_s20 }
 0x573   : > { %p2366_p5 = por %p2365_p3, %p2364_p1 }
 0x575   : > { %p2367_p10 = pnand %p2366_p5, %p2360_p4 }
 0x5b3   : > { %v1084_v49 = vpop.permute.xlu1 %1083 }
 0x5b4   : > { %1087 = vst.msk [vmem:[#allocation2] sm:$0xff] %vm1086_vm5, %v1084_v49 }
 0x5d8   : > { %v1200_v50 = vpop.permute.xlu0 %1199 }
 0x5d9   : > { %1203 = vst.msk [vmem:[#allocation2] sm:$0xff] %vm1202_vm6, %v1200_v50 }
 0x5e0   : > { %v1316_v51 = vpop.permute.xlu1 %1315 }
 0x5e1   : > { %1319 = vst.msk [vmem:[#allocation2] sm:$0xff] %vm1318_vm7, %v1316_v51 }
 0x5e8   : > { %v1320_v52 = vld [vmem:[#allocation2] sm:$0xff] }
 0x5e9   : > { %v1321_v53 = vpack.c.bf16 %v1320_v52, %v1320_v52 }
 0x5eb   : > { %2016 = vmatmul.mubr.msk.bf16.vlgmr.msra.gmra.mrb[16].mxu1 %vm808_vm2, %v1321_v53 }
 0x5ec   : > { %2035 = vmatprep.mubr.msk.bf16.mxu1 %vm2495_vm1, %v2494_v2 }
 0x6be   : > { %v1382_v55 = vpop.f32.mrb[16].mxu1 }
 0x6bf   : > { %v1383_v56 = vadd.f32 %v1899_v54, %v1382_v55  ;;  %v2017_v57 = vpop.f32.mrb[17].mxu1 }
 0x6c0   : > { %v1385_v58 = vpop.f32.mrb[18].mxu1 }
 0x6c1   : > { %v2018_v59 = vpop.f32.mrb[19].mxu1  ;;  %v1388_v60 = vadd.f32 %v1383_v56, %v2993_v4  ;;  %v2183_v4 = vld [vmem:[%s2966_s14] sm:$0xff]  }
 0x6c2   : > { %2028 = vmatpush3.bf16.msra.mxu1 %v2183_v4 }
 0x6c3   : > { %v1389_v61 = vsel %vm808_vm2, %v1388_v60, 0.0  ;;  %2029 = vmatprep.subr.bf16.mxu1 %v2494_v2 }
 0x6c4   : > { %1390 = vadd.xlane.f32.xlu0 %v1389_v61 }
 0x6c6   : > { %2030 = vmatpush3.bf16.msra.mxu1 %v2184_v7 }
 0x6c7   : > { %2031 = vmatprep.subr.bf16.mxu1 %v2494_v2 }
 0x6ca   : > { %2032 = vmatpush3.bf16.msra.mxu1 %v2185_v11 }
 0x6cb   : > { %2033 = vmatprep.subr.bf16.mxu1 %v2494_v2 }
 0x6ce   : > { %2034 = vmatpush3.bf16.msra.mxu1 %v2186_v19 }
 0x751   : > { %v1391_v62 = vpop.xlane.xlu0 %1390 }
 0x752   : > { %v1393_v63 = vmul.f32 0.03125, %v1391_v62 }
 0x754   : > { %v1394_v0 = vsub.f32 %v1388_v60, %v1393_v63 }
 0x756   : > { %v1395_v1 = vmul.f32 %v1394_v0, %v1394_v0 }
 0x758   : > { %v1396_v3 = vsel %vm808_vm2, %v1395_v1, 0.0 }
 0x759   : > { %1397 = vadd.xlane.f32.xlu1 %v1396_v3 }
 0x7e6   : > { %v1398_v8 = vpop.xlane.xlu1 %1397 }
 0x7e7   : > { %v1399_v9 = vmul.f32 0.03125, %v1398_v8 }
 0x7e9   : > { %v1400_v10 = vadd.f32 1e-05, %v1399_v9 }
 0x7eb   : > { %2203 = vrsqrt.f32 %v1400_v10 }
 0x7f5   : > { %v2204_v12 = vpop.eup %2203 }
 0x7f6   : > { %v1402_v14 = vmul.f32 %v2204_v12, %v1394_v0 }
 0x7f8   : > { %v1410_v16 = vmul.f32 %v1903_v13, %v1402_v14 }
 0x7fa   : > { %v1418_v17 = vadd.f32 %v1904_v15, %v1410_v16 }
 0x7fc   : > { %v1419_v18 = vpack.c.bf16 %v1418_v17, %v1418_v17 }
 0x7fe   : > { %2024 = vmatmul.mubr.msk.bf16.vlgmr.msra.gmra.mrb[20].mxu0 %vm808_vm2, %v1419_v18 }
 0x8d1   : > { %v1480_v21 = vpop.f32.mrb[20].mxu0 }
 0x8d2   : > { %v1481_v22 = vadd.f32 %v1905_v20, %v1480_v21  ;;  %v2025_v23 = vpop.f32.mrb[21].mxu0 }
 0x8d3   : > { %v1483_v24 = vpop.f32.mrb[22].mxu0 }
 0x8d4   : > { %v1486_v25 = vmax.f32 %v1481_v22, 0.0  ;;  %v2026_v26 = vpop.f32.mrb[23].mxu0 }
 0x8d6   : > { %v1487_v27 = vpack.c.bf16 %v1486_v25, %v1486_v25 }
 0x8d8   : > { %2036 = vmatmul.mubr.msk.bf16.vlgmr.msra.gmra.mrb[20].mxu1 %vm1527_vm8, %v1487_v27 }
 0x9ab   : > { %v1565_v29 = vpop.f32.mrb[20].mxu1 }
 0x9ac   : > { %v1566_v2 = vadd.f32 %v1909_v28, %v1565_v29  ;;  %v2037_v30 = vpop.f32.mrb[21].mxu1 }
 0x9ad   : > { %v1568_v31 = vpop.f32.mrb[22].mxu1 }
 0x9ae   : > { %v2038_v32 = vpop.f32.mrb[23].mxu1  ;;  %v1571_v33 = vadd.f32 %v1566_v2, %v1418_v17 }
 0x9b0   : > { %v1572_v34 = vsel %vm808_vm2, %v1571_v33, 0.0 }
 0x9b1   : > { %1573 = vadd.xlane.f32.xlu0 %v1572_v34 }
 0xa3e   : > { %v1574_v35 = vpop.xlane.xlu0 %1573 }
 0xa3f   : > { %v1575_v36 = vmul.f32 0.03125, %v1574_v35 }
 0xa41   : > { %v1576_v37 = vsub.f32 %v1571_v33, %v1575_v36 }
 0xa43   : > { %v1577_v38 = vmul.f32 %v1576_v37, %v1576_v37 }
 0xa45   : > { %v1578_v39 = vsel %vm808_vm2, %v1577_v38, 0.0 }
 0xa46   : > { %1579 = vadd.xlane.f32.xlu0 %v1578_v39 }
 0xad3   : > { %v1580_v40 = vpop.xlane.xlu0 %1579 }
 0xad4   : > { %v1581_v41 = vmul.f32 0.03125, %v1580_v40 }
 0xad6   : > { %v1582_v42 = vadd.f32 1e-05, %v1581_v41 }
 0xad8   : > { %2205 = vrsqrt.f32 %v1582_v42 }
 0xae2   : > { %v2206_v43 = vpop.eup %2205 }
 0xae3   : > { %v1584_v45 = vmul.f32 %v2206_v43, %v1576_v37 }
 0xae5   : > { %v1592_v47 = vmul.f32 %v1915_v44, %v1584_v45 }
 0xae7   : > { %v1600_v48 = vadd.f32 %v1916_v46, %v1592_v47 }
 0xae9   : > { %1601 = vst.msk [vmem:[%s2983_s22] sm:$0xff] %vm808_vm2, %v1600_v48 }
 0xaea   : > { %2370 = shalt.err (!%p2367_p10)
}
 0xaeb   : > { %s2371_s21 = scalar_lea.hbm %s3128_s25, 128  ;;  %s2375_s16 = scalar_lea.hbm %s3315_s1, 256 }
 0xaec   : > { %p2372_p8 = scmp.ne.s32.totalorder %s3128_s25, %s2371_s21  ;;  %p2376_p2 = scmp.lt.u32.totalorder %s3128_s25, %s3315_s1 }
 0xaed   : > { %p2377_p6 = scmp.lt.u32.totalorder %s2375_s16, %s2371_s21  ;;  %p2379_p12 = scmp.lt.u32.totalorder %s2371_s21, %s3128_s25 }
 0xaee   : > { %p2373_p11 = pnand %p2372_p8, %p3316_p13 }
 0xaef   : > { %p2378_p7 = por %p2377_p6, %p2376_p2 }
 0xaf0   : > { %p2374_p9 = pneg %p2373_p11 }
 0xaf1   : > { %p2380_p0 = por %p2379_p12, %p2378_p7 }
 0xaf3   : > { %p2381_p4 = pnand %p2380_p0, %p2374_p9 }
 0xaf5   : > { %2384 = shalt.err (!%p2381_p4)
}
 0xaf6   : > { %2049 = dma.vmem_to_hbm [thread:$0]  (%p3316_p13), %s3130_s12, 128, %s3128_s25, %s1603_s24  }
 0xaf7 PF: > { %s3317_s19 = sld [smem:[#allocation19_spill]]  ;;  %s3318_s6 = sld [smem:[#allocation31_spill]] }
 0xaf8   : > { %p2072_p1 = scmp.ge.s32.totalorder %s2487_s23, 2 }
 0xafd   : > { %s1628_s2 = sand.u32 1, %s3317_s19   ;;  %p3319_p3 = scmp.ne.s32.totalorder %s3318_s6, 0 }
 0xafe   : > { %s1629_s13 = scalar_lea.sflag [#allocation5], %s1628_s2 }
 0xaff   : > { %p2068_p5 = pnand %p2072_p1, %p3319_p3 }
 0xb01   : > { %2442 = dma.done.wait (!%p2068_p5), %s1629_s13, 128  }
 0xb02   : > { %2444 = vsyncadd (!%p2068_p5), %s1629_s13, 4294967168  ;;  %s36_s23 = sadd.s32 1, %s2487_s23   ;;  %s3320_s29 = sld [smem:[#allocation17_spill]] }
 0xb03   : > { %p33_p10 = scmp.ge.s32.totalorder %s36_s23, 6   ;;  %s3321_s30 = sld [smem:[#allocation18_spill]] }
 0xb04   : > { %s3322_s15 = sld [smem:[#allocation27_spill]]  ;;  %s3323_s16 = sld [smem:[#allocation20_spill]] }
 0xb05   : > { %s3324_s17 = sld [smem:[#allocation21_spill]]  ;;  %s3325_s18 = sld [smem:[#allocation30_spill]] }
 0xb06   : > { %s3326_s19 = sld [smem:[#allocation24_spill]]  ;;  %s3327_s20 = sld [smem:[#allocation25_spill]] }
 0xb07   : > { %s3328_s21 = sld [smem:[#allocation26_spill]]  ;;  %s3329_s22 = sld [smem:[#allocation28_spill]] }
 0xb08   :  { %35 = sbr.rel (!%p33_p10) target bundleno = 29 (0x1d), region = 200 }
 0xb0f   :  { %1634 = vsyncpa [#allocation4], 1 }
 0xb10   :  { %1636 = vsyncpa [#allocation4 + $0x1], 1 }
 0xb11   :  { %1637 = vsyncpa [#allocation7], 1 }
 0xb12   :  { %1639 = vsyncpa [#allocation7 + $0x1], 1 }
 0xb13   :  { %1640 = vsyncpa [#allocation10], 1 }
 0xb14   :  { %1642 = vsyncpa [#allocation10 + $0x1], 1 }
 0xb15   :  { %1643 = vsyncpa [#allocation5], 1 }
 0xb16   :  { %1645 = vsyncpa [#allocation5 + $0x1], 1 }

</bundles_post_ra>
